<compile_context>
chip_gen: v7x
topology: tpu7x:2x2x1
jax: 0.10.0
libtpu: 0.0.40
codegen_flags: <defaults>
</compile_context>

<pallas_src>
import jax
import jax.numpy as jnp
from jax.experimental import pallas as pl
from jax.experimental.pallas import tpu as pltpu

EPS = 1e-5


def basic_block_kernel(x_ref, w1_ref, g1_ref, b1_ref,
                       w2_ref, g2_ref, b2_ref, out_ref):
    N, H, W, C = x_ref.shape
    M = N * H * W

    # Flatten to (M, C) in f32: W == 8 == sublane tile, so this collapse of the
    # leading dims is layout-preserving.  Also the residual path.
    x2d = x_ref[...].reshape(M, C)

    # Boundary masks for the implicit 'same' padding, built once and shared by
    # both convs (row m = ((n*H + h)*W + w)).
    row = jax.lax.broadcasted_iota(jnp.int32, (M, C), 0)
    w_pos = row % W
    r_pos = row % (H * W)
    at_w0 = w_pos == 0            # w == 0      -> no left  (dx=-1) neighbor
    at_wL = w_pos == W - 1        # w == W-1    -> no right (dx=+1) neighbor
    at_h0 = r_pos < W             # h == 0      -> no up    (dy=-1) neighbor
    at_hL = r_pos >= (H - 1) * W  # h == H-1    -> no down  (dy=+1) neighbor
    zero = jnp.float32(0.0)

    def conv3x3(h, w_ref):
        # dx taps via XLU sublane rolls on the flat f32 activation (no W pad,
        # everything stays tile aligned); wrapped rows zeroed by the masks.
        left = jnp.where(at_w0, zero, pltpu.roll(h, 1, axis=0))       # x[m-1]
        right = jnp.where(at_wL, zero, pltpu.roll(h, M - 1, axis=0))  # x[m+1]
        # Cast each tap to bf16 BEFORE the lane concat -> (M, 3C) bf16 slab.
        col = jnp.concatenate([left.astype(jnp.bfloat16),
                               h.astype(jnp.bfloat16),
                               right.astype(jnp.bfloat16)], axis=-1)
        # Single MXU matmul; weight cols are ordered (dy, cout), so lane block
        # dy of p is that kernel-row's contribution evaluated at its source
        # row.  Apply the dy shift to the f32 outputs (rolls of +/-W rows,
        # i.e. whole-vreg sublane shifts) with h-boundary masks.
        p = jnp.dot(col, w_ref[...], preferred_element_type=jnp.float32)
        up = jnp.where(at_h0, zero, pltpu.roll(p[:, :C], W, axis=0))
        down = jnp.where(at_hL, zero, pltpu.roll(p[:, 2 * C:], M - W, axis=0))
        return p[:, C:2 * C] + up + down

    def bn(y, g, b, relu):
        # Training-mode BatchNorm (batch mean, biased batch variance), fused
        # per-channel affine.  One-pass variance clamped at 0 to guard against
        # catastrophic cancellation.  All stats/normalization in f32.
        mean = jnp.mean(y, axis=0, keepdims=True)
        ex2 = jnp.mean(y * y, axis=0, keepdims=True)
        var = jnp.maximum(ex2 - mean * mean, 0.0)
        scale = g * jax.lax.rsqrt(var + EPS)
        shift = b - mean * scale
        y = y * scale + shift
        return jnp.maximum(y, 0.0) if relu else y

    h1 = bn(conv3x3(x2d, w1_ref), g1_ref[...], b1_ref[...], relu=True)
    h2 = bn(conv3x3(h1, w2_ref), g2_ref[...], b2_ref[...], relu=False)

    out = jnp.maximum(h2 + x2d, 0.0)                 # residual add + ReLU
    out_ref[...] = out.reshape(N, H, W, C).astype(out_ref.dtype)


def prepare_block_params(params):
    """Host-side, done once (hoisted out of the forward wrapper).

    HWIO (3, 3, Cin, Cout) -> (3*Cin, 3*Cout) bf16 with rows ordered (dx, cin)
    (matching the kernel's dx lane-concat im2col) and cols ordered (dy, cout)
    (matching the kernel's dy output-shift accumulation).
    """
    def prep(w):
        kh, kw, cin, cout = w.shape
        return (jnp.transpose(w, (1, 2, 0, 3))
                .reshape(kw * cin, kh * cout).astype(jnp.bfloat16))

    return {"w1m": prep(params["w1"]), "w2m": prep(params["w2"]),
            "g1": params["g1"], "b1": params["b1"],
            "g2": params["g2"], "b2": params["b2"]}


@jax.jit
def basic_block_forward(x, prepped):
    N, H, W, C = x.shape
    assert prepped["w1m"].shape == (3 * C, 3 * C), (
        "identity path requires in_channel == out_channel (stride=1, no downsample)")

    args = (x, prepped["w1m"], prepped["g1"], prepped["b1"],
            prepped["w2m"], prepped["g2"], prepped["b2"])
    return pl.pallas_call(
        basic_block_kernel,
        out_shape=jax.ShapeDtypeStruct((N, H, W, C), jnp.float32),
        in_specs=[pl.BlockSpec(memory_space=pltpu.MemorySpace.VMEM)] * len(args),
        out_specs=pl.BlockSpec(memory_space=pltpu.MemorySpace.VMEM),
    )(*args)


def basic_block_reference(x, params, conv_dtype=jnp.float32):
    """Pure-JAX NHWC reference (training-mode BN).  conv_dtype lets us check
    both same-math (bf16 conv operands, f32 accumulation) numerics and the
    pure-f32 baseline."""
    def bn(y, g, b, relu):
        mean = y.mean(axis=(0, 1, 2), keepdims=True)
        var = ((y - mean) ** 2).mean(axis=(0, 1, 2), keepdims=True)
        y = (y - mean) / jnp.sqrt(var + EPS)
        y = y * g.reshape(1, 1, 1, -1) + b.reshape(1, 1, 1, -1)
        return jnp.maximum(y, 0.0) if relu else y

    dn = ("NHWC", "HWIO", "NHWC")

    def conv(h, w):
        return jax.lax.conv_general_dilated(
            h.astype(conv_dtype), w.astype(conv_dtype), (1, 1),
            ((1, 1), (1, 1)), dimension_numbers=dn,
            preferred_element_type=jnp.float32)

    h = bn(conv(x, params["w1"]), params["g1"], params["b1"], True)
    h = bn(conv(h, params["w2"]), params["g2"], params["b2"], False)
    return jnp.maximum(h + x, 0.0)


def make_params(key, in_channel, out_channel):
    C = out_channel
    ks = jax.random.split(key, 6)
    return {
        "w1": 0.1 * jax.random.normal(ks[0], (3, 3, in_channel, C), jnp.float32),
        "g1": 1.0 + 0.1 * jax.random.normal(ks[1], (1, C), jnp.float32),
        "b1": 0.1 * jax.random.normal(ks[2], (1, C), jnp.float32),
        "w2": 0.1 * jax.random.normal(ks[3], (3, 3, C, C), jnp.float32),
        "g2": 1.0 + 0.1 * jax.random.normal(ks[4], (1, C), jnp.float32),
        "b2": 0.1 * jax.random.normal(ks[5], (1, C), jnp.float32),
    }


if __name__ == "__main__":
    key = jax.random.PRNGKey(0)
    k_x, k_p = jax.random.split(key)

    # BasicBlock(in_channel=128, out_channel=128, stride=1, downsample=None)
    # NHWC input (PyTorch equivalent would be NCHW [2, 128, 8, 8]).
    N, H, W, C = 2, 8, 8, 128
    x = jax.random.normal(k_x, (N, H, W, C), jnp.float32)
    params = make_params(k_p, C, C)
    prepped = prepare_block_params(params)        # weight prep hoisted, once

    out = jax.block_until_ready(basic_block_forward(x, prepped))
    assert out.shape == (N, H, W, C)

    # Same-math reference (bf16 conv operands, f32 accumulation): tight check.
    ref_bf16 = basic_block_reference(x, params, conv_dtype=jnp.bfloat16)
    assert jnp.allclose(out, ref_bf16, atol=1e-2, rtol=1e-2), (
        float(jnp.max(jnp.abs(out - ref_bf16))))

    # Pure-f32 reference: loose check (bf16 MXU operands per perf guidance).
    ref_f32 = basic_block_reference(x, params, conv_dtype=jnp.float32)
    assert jnp.allclose(out, ref_f32, atol=1e-1, rtol=1e-1), (
        float(jnp.max(jnp.abs(out - ref_f32))))

    print("KERNEL_OK")
</pallas_src>

<mosaic_0001>
module attributes {stable_mosaic.version = 11 : i64} {
  func.func @basic_block_kernel(%arg0: memref<2x8x8x128xf32, #tpu.memory_space<vmem>>, %arg1: memref<384x384xbf16, #tpu.memory_space<vmem>>, %arg2: memref<1x128xf32, #tpu.memory_space<vmem>>, %arg3: memref<1x128xf32, #tpu.memory_space<vmem>>, %arg4: memref<384x384xbf16, #tpu.memory_space<vmem>>, %arg5: memref<1x128xf32, #tpu.memory_space<vmem>>, %arg6: memref<1x128xf32, #tpu.memory_space<vmem>>, %arg7: memref<2x8x8x128xf32, #tpu.memory_space<vmem>>) attributes {dimension_semantics = [], scalar_prefetch = 0 : i64, scratch_operands = 0 : i64, tpu.core_type = #tpu.core_type<tc>} {
    %c0 = arith.constant 0 : index
    %c0_0 = arith.constant 0 : index
    %c0_1 = arith.constant 0 : index
    %c0_2 = arith.constant 0 : index
    %0 = vector.load %arg0[%c0, %c0_0, %c0_1, %c0_2] : memref<2x8x8x128xf32, #tpu.memory_space<vmem>>, vector<2x8x8x128xf32>
    %1 = vector.shape_cast %0 : vector<2x8x8x128xf32> to vector<128x128xf32>
    %2 = tpu.iota {dimensions = array<i32: 0>} : vector<128x128xi32>
    %c8_i32 = arith.constant 8 : i32
    %c0_i32 = arith.constant 0 : i32
    %3 = arith.cmpi eq, %c8_i32, %c0_i32 : i32
    %c1_i32 = arith.constant 1 : i32
    %4 = arith.select %3, %c1_i32, %c8_i32 : i32
    %5 = vector.broadcast %4 : i32 to vector<128x128xi32>
    %6 = arith.remsi %2, %5 : vector<128x128xi32>
    %c0_i32_3 = arith.constant 0 : i32
    %7 = vector.broadcast %c0_i32_3 : i32 to vector<128x128xi32>
    %8 = arith.cmpi ne, %6, %7 : vector<128x128xi32>
    %c0_i32_4 = arith.constant 0 : i32
    %9 = vector.broadcast %c0_i32_4 : i32 to vector<128x128xi32>
    %10 = arith.cmpi slt, %6, %9 : vector<128x128xi32>
    %c0_i32_5 = arith.constant 0 : i32
    %11 = arith.cmpi slt, %4, %c0_i32_5 : i32
    %12 = vector.broadcast %11 : i1 to vector<128x128xi1>
    %13 = vector.broadcast %12 : vector<128x128xi1> to vector<128x128xi1>
    %14 = arith.xori %10, %13 : vector<128x128xi1>
    %15 = arith.andi %14, %8 : vector<128x128xi1>
    %16 = vector.broadcast %4 : i32 to vector<128x128xi32>
    %17 = arith.addi %6, %16 : vector<128x128xi32>
    %18 = arith.select %15, %17, %6 : vector<128x128xi1>, vector<128x128xi32>
    %c64_i32 = arith.constant 64 : i32
    %c0_i32_6 = arith.constant 0 : i32
    %19 = arith.cmpi eq, %c64_i32, %c0_i32_6 : i32
    %c1_i32_7 = arith.constant 1 : i32
    %20 = arith.select %19, %c1_i32_7, %c64_i32 : i32
    %21 = vector.broadcast %20 : i32 to vector<128x128xi32>
    %22 = arith.remsi %2, %21 : vector<128x128xi32>
    %c0_i32_8 = arith.constant 0 : i32
    %23 = vector.broadcast %c0_i32_8 : i32 to vector<128x128xi32>
    %24 = arith.cmpi ne, %22, %23 : vector<128x128xi32>
    %c0_i32_9 = arith.constant 0 : i32
    %25 = vector.broadcast %c0_i32_9 : i32 to vector<128x128xi32>
    %26 = arith.cmpi slt, %22, %25 : vector<128x128xi32>
    %c0_i32_10 = arith.constant 0 : i32
    %27 = arith.cmpi slt, %20, %c0_i32_10 : i32
    %28 = vector.broadcast %27 : i1 to vector<128x128xi1>
    %29 = vector.broadcast %28 : vector<128x128xi1> to vector<128x128xi1>
    %30 = arith.xori %26, %29 : vector<128x128xi1>
    %31 = arith.andi %30, %24 : vector<128x128xi1>
    %32 = vector.broadcast %20 : i32 to vector<128x128xi32>
    %33 = arith.addi %22, %32 : vector<128x128xi32>
    %34 = arith.select %31, %33, %22 : vector<128x128xi1>, vector<128x128xi32>
    %c0_i32_11 = arith.constant 0 : i32
    %35 = vector.broadcast %c0_i32_11 : i32 to vector<128x128xi32>
    %36 = arith.cmpi eq, %18, %35 : vector<128x128xi32>
    %c7_i32 = arith.constant 7 : i32
    %37 = vector.broadcast %c7_i32 : i32 to vector<128x128xi32>
    %38 = arith.cmpi eq, %18, %37 : vector<128x128xi32>
    %c8_i32_12 = arith.constant 8 : i32
    %39 = vector.broadcast %c8_i32_12 : i32 to vector<128x128xi32>
    %40 = arith.cmpi slt, %34, %39 : vector<128x128xi32>
    %c56_i32 = arith.constant 56 : i32
    %41 = vector.broadcast %c56_i32 : i32 to vector<128x128xi32>
    %42 = arith.cmpi sge, %34, %41 : vector<128x128xi32>
    %c1_i32_13 = arith.constant 1 : i32
    %43 = tpu.dynamic_rotate %1 by %c1_i32_13 dim 0 : vector<128x128xf32>, i32 -> vector<128x128xf32>
    %cst = arith.constant 0.000000e+00 : f32
    %44 = vector.broadcast %cst : f32 to vector<128x128xf32>
    %45 = arith.select %36, %44, %43 : vector<128x128xi1>, vector<128x128xf32>
    %c127_i32 = arith.constant 127 : i32
    %46 = tpu.dynamic_rotate %1 by %c127_i32 dim 0 : vector<128x128xf32>, i32 -> vector<128x128xf32>
    %cst_14 = arith.constant 0.000000e+00 : f32
    %47 = vector.broadcast %cst_14 : f32 to vector<128x128xf32>
    %48 = arith.select %38, %47, %46 : vector<128x128xi1>, vector<128x128xf32>
    %49 = arith.truncf %45 : vector<128x128xf32> to vector<128x128xbf16>
    %50 = arith.truncf %1 : vector<128x128xf32> to vector<128x128xbf16>
    %51 = arith.truncf %48 : vector<128x128xf32> to vector<128x128xbf16>
    %52 = tpu.concatenate %49, %50, %51 in 1 : vector<128x128xbf16>, vector<128x128xbf16>, vector<128x128xbf16> -> vector<128x384xbf16>
    %c0_15 = arith.constant 0 : index
    %c0_16 = arith.constant 0 : index
    %53 = vector.load %arg1[%c0_15, %c0_16] : memref<384x384xbf16, #tpu.memory_space<vmem>>, vector<384x384xbf16>
    %cst_17 = arith.constant dense<0.000000e+00> : vector<128x384xf32>
    %54 = tpu.matmul %52, %53, %cst_17 {dimension_numbers = #tpu.dot_dimension_numbers<[1], [0], [0], [1], [0, 0, 1, 1], [], []>} : vector<128x384xbf16>, vector<384x384xbf16>, vector<128x384xf32> -> vector<128x384xf32>
    %55 = vector.extract_strided_slice %54 {offsets = [0, 0], sizes = [128, 128], strides = [1, 1]} : vector<128x384xf32> to vector<128x128xf32>
    %c8_i32_18 = arith.constant 8 : i32
    %56 = tpu.dynamic_rotate %55 by %c8_i32_18 dim 0 : vector<128x128xf32>, i32 -> vector<128x128xf32>
    %cst_19 = arith.constant 0.000000e+00 : f32
    %57 = vector.broadcast %cst_19 : f32 to vector<128x128xf32>
    %58 = arith.select %40, %57, %56 : vector<128x128xi1>, vector<128x128xf32>
    %59 = vector.extract_strided_slice %54 {offsets = [0, 256], sizes = [128, 128], strides = [1, 1]} : vector<128x384xf32> to vector<128x128xf32>
    %c120_i32 = arith.constant 120 : i32
    %60 = tpu.dynamic_rotate %59 by %c120_i32 dim 0 : vector<128x128xf32>, i32 -> vector<128x128xf32>
    %cst_20 = arith.constant 0.000000e+00 : f32
    %61 = vector.broadcast %cst_20 : f32 to vector<128x128xf32>
    %62 = arith.select %42, %61, %60 : vector<128x128xi1>, vector<128x128xf32>
    %63 = vector.extract_strided_slice %54 {offsets = [0, 128], sizes = [128, 128], strides = [1, 1]} : vector<128x384xf32> to vector<128x128xf32>
    %64 = arith.addf %63, %58 : vector<128x128xf32>
    %65 = arith.addf %64, %62 : vector<128x128xf32>
    %c0_21 = arith.constant 0 : index
    %c0_22 = arith.constant 0 : index
    %66 = vector.load %arg2[%c0_21, %c0_22] : memref<1x128xf32, #tpu.memory_space<vmem>>, vector<1x128xf32>
    %c0_23 = arith.constant 0 : index
    %c0_24 = arith.constant 0 : index
    %67 = vector.load %arg3[%c0_23, %c0_24] : memref<1x128xf32, #tpu.memory_space<vmem>>, vector<1x128xf32>
    %cst_25 = arith.constant dense<0.000000e+00> : vector<128xf32>
    %68 = vector.multi_reduction <add>, %65, %cst_25 [0] : vector<128x128xf32> to vector<128xf32>
    %69 = vector.shape_cast %68 : vector<128xf32> to vector<1x128xf32>
    %cst_26 = arith.constant 1.280000e+02 : f32
    %70 = vector.broadcast %cst_26 : f32 to vector<1x128xf32>
    %71 = arith.divf %69, %70 : vector<1x128xf32>
    %72 = arith.mulf %65, %65 : vector<128x128xf32>
    %cst_27 = arith.constant dense<0.000000e+00> : vector<128xf32>
    %73 = vector.multi_reduction <add>, %72, %cst_27 [0] : vector<128x128xf32> to vector<128xf32>
    %74 = vector.shape_cast %73 : vector<128xf32> to vector<1x128xf32>
    %cst_28 = arith.constant 1.280000e+02 : f32
    %75 = vector.broadcast %cst_28 : f32 to vector<1x128xf32>
    %76 = arith.divf %74, %75 : vector<1x128xf32>
    %77 = arith.mulf %71, %71 : vector<1x128xf32>
    %78 = arith.subf %76, %77 : vector<1x128xf32>
    %cst_29 = arith.constant 0.000000e+00 : f32
    %79 = vector.broadcast %cst_29 : f32 to vector<1x128xf32>
    %80 = arith.maximumf %78, %79 : vector<1x128xf32>
    %cst_30 = arith.constant 9.99999974E-6 : f32
    %81 = vector.broadcast %cst_30 : f32 to vector<1x128xf32>
    %82 = arith.addf %80, %81 : vector<1x128xf32>
    %83 = math.rsqrt %82 : vector<1x128xf32>
    %84 = arith.mulf %66, %83 : vector<1x128xf32>
    %85 = arith.mulf %71, %84 : vector<1x128xf32>
    %86 = arith.subf %67, %85 : vector<1x128xf32>
    %87 = vector.broadcast %84 : vector<1x128xf32> to vector<128x128xf32>
    %88 = arith.mulf %65, %87 : vector<128x128xf32>
    %89 = vector.broadcast %86 : vector<1x128xf32> to vector<128x128xf32>
    %90 = arith.addf %88, %89 : vector<128x128xf32>
    %cst_31 = arith.constant 0.000000e+00 : f32
    %91 = vector.broadcast %cst_31 : f32 to vector<128x128xf32>
    %92 = arith.maximumf %90, %91 : vector<128x128xf32>
    %c1_i32_32 = arith.constant 1 : i32
    %93 = tpu.dynamic_rotate %92 by %c1_i32_32 dim 0 : vector<128x128xf32>, i32 -> vector<128x128xf32>
    %cst_33 = arith.constant 0.000000e+00 : f32
    %94 = vector.broadcast %cst_33 : f32 to vector<128x128xf32>
    %95 = arith.select %36, %94, %93 : vector<128x128xi1>, vector<128x128xf32>
    %c127_i32_34 = arith.constant 127 : i32
    %96 = tpu.dynamic_rotate %92 by %c127_i32_34 dim 0 : vector<128x128xf32>, i32 -> vector<128x128xf32>
    %cst_35 = arith.constant 0.000000e+00 : f32
    %97 = vector.broadcast %cst_35 : f32 to vector<128x128xf32>
    %98 = arith.select %38, %97, %96 : vector<128x128xi1>, vector<128x128xf32>
    %99 = arith.truncf %95 : vector<128x128xf32> to vector<128x128xbf16>
    %100 = arith.truncf %92 : vector<128x128xf32> to vector<128x128xbf16>
    %101 = arith.truncf %98 : vector<128x128xf32> to vector<128x128xbf16>
    %102 = tpu.concatenate %99, %100, %101 in 1 : vector<128x128xbf16>, vector<128x128xbf16>, vector<128x128xbf16> -> vector<128x384xbf16>
    %c0_36 = arith.constant 0 : index
    %c0_37 = arith.constant 0 : index
    %103 = vector.load %arg4[%c0_36, %c0_37] : memref<384x384xbf16, #tpu.memory_space<vmem>>, vector<384x384xbf16>
    %cst_38 = arith.constant dense<0.000000e+00> : vector<128x384xf32>
    %104 = tpu.matmul %102, %103, %cst_38 {dimension_numbers = #tpu.dot_dimension_numbers<[1], [0], [0], [1], [0, 0, 1, 1], [], []>} : vector<128x384xbf16>, vector<384x384xbf16>, vector<128x384xf32> -> vector<128x384xf32>
    %105 = vector.extract_strided_slice %104 {offsets = [0, 0], sizes = [128, 128], strides = [1, 1]} : vector<128x384xf32> to vector<128x128xf32>
    %c8_i32_39 = arith.constant 8 : i32
    %106 = tpu.dynamic_rotate %105 by %c8_i32_39 dim 0 : vector<128x128xf32>, i32 -> vector<128x128xf32>
    %cst_40 = arith.constant 0.000000e+00 : f32
    %107 = vector.broadcast %cst_40 : f32 to vector<128x128xf32>
    %108 = arith.select %40, %107, %106 : vector<128x128xi1>, vector<128x128xf32>
    %109 = vector.extract_strided_slice %104 {offsets = [0, 256], sizes = [128, 128], strides = [1, 1]} : vector<128x384xf32> to vector<128x128xf32>
    %c120_i32_41 = arith.constant 120 : i32
    %110 = tpu.dynamic_rotate %109 by %c120_i32_41 dim 0 : vector<128x128xf32>, i32 -> vector<128x128xf32>
    %cst_42 = arith.constant 0.000000e+00 : f32
    %111 = vector.broadcast %cst_42 : f32 to vector<128x128xf32>
    %112 = arith.select %42, %111, %110 : vector<128x128xi1>, vector<128x128xf32>
    %113 = vector.extract_strided_slice %104 {offsets = [0, 128], sizes = [128, 128], strides = [1, 1]} : vector<128x384xf32> to vector<128x128xf32>
    %114 = arith.addf %113, %108 : vector<128x128xf32>
    %115 = arith.addf %114, %112 : vector<128x128xf32>
    %c0_43 = arith.constant 0 : index
    %c0_44 = arith.constant 0 : index
    %116 = vector.load %arg5[%c0_43, %c0_44] : memref<1x128xf32, #tpu.memory_space<vmem>>, vector<1x128xf32>
    %c0_45 = arith.constant 0 : index
    %c0_46 = arith.constant 0 : index
    %117 = vector.load %arg6[%c0_45, %c0_46] : memref<1x128xf32, #tpu.memory_space<vmem>>, vector<1x128xf32>
    %cst_47 = arith.constant dense<0.000000e+00> : vector<128xf32>
    %118 = vector.multi_reduction <add>, %115, %cst_47 [0] : vector<128x128xf32> to vector<128xf32>
    %119 = vector.shape_cast %118 : vector<128xf32> to vector<1x128xf32>
    %cst_48 = arith.constant 1.280000e+02 : f32
    %120 = vector.broadcast %cst_48 : f32 to vector<1x128xf32>
    %121 = arith.divf %119, %120 : vector<1x128xf32>
    %122 = arith.mulf %115, %115 : vector<128x128xf32>
    %cst_49 = arith.constant dense<0.000000e+00> : vector<128xf32>
    %123 = vector.multi_reduction <add>, %122, %cst_49 [0] : vector<128x128xf32> to vector<128xf32>
    %124 = vector.shape_cast %123 : vector<128xf32> to vector<1x128xf32>
    %cst_50 = arith.constant 1.280000e+02 : f32
    %125 = vector.broadcast %cst_50 : f32 to vector<1x128xf32>
    %126 = arith.divf %124, %125 : vector<1x128xf32>
    %127 = arith.mulf %121, %121 : vector<1x128xf32>
    %128 = arith.subf %126, %127 : vector<1x128xf32>
    %cst_51 = arith.constant 0.000000e+00 : f32
    %129 = vector.broadcast %cst_51 : f32 to vector<1x128xf32>
    %130 = arith.maximumf %128, %129 : vector<1x128xf32>
    %cst_52 = arith.constant 9.99999974E-6 : f32
    %131 = vector.broadcast %cst_52 : f32 to vector<1x128xf32>
    %132 = arith.addf %130, %131 : vector<1x128xf32>
    %133 = math.rsqrt %132 : vector<1x128xf32>
    %134 = arith.mulf %116, %133 : vector<1x128xf32>
    %135 = arith.mulf %121, %134 : vector<1x128xf32>
    %136 = arith.subf %117, %135 : vector<1x128xf32>
    %137 = vector.broadcast %134 : vector<1x128xf32> to vector<128x128xf32>
    %138 = arith.mulf %115, %137 : vector<128x128xf32>
    %139 = vector.broadcast %136 : vector<1x128xf32> to vector<128x128xf32>
    %140 = arith.addf %138, %139 : vector<128x128xf32>
    %141 = arith.addf %140, %1 : vector<128x128xf32>
    %cst_53 = arith.constant 0.000000e+00 : f32
    %142 = vector.broadcast %cst_53 : f32 to vector<128x128xf32>
    %143 = arith.maximumf %141, %142 : vector<128x128xf32>
    %144 = vector.shape_cast %143 : vector<128x128xf32> to vector<2x8x8x128xf32>
    %c0_54 = arith.constant 0 : index
    %c0_55 = arith.constant 0 : index
    %c0_56 = arith.constant 0 : index
    %c0_57 = arith.constant 0 : index
    %145 = vector.load %arg7[%c0_54, %c0_55, %c0_56, %c0_57] : memref<2x8x8x128xf32, #tpu.memory_space<vmem>>, vector<2x8x8x128xf32>
    tpu.vector_store %arg7[%c0_54, %c0_55, %c0_56, %c0_57], %144 {strides = array<i32>} : memref<2x8x8x128xf32, #tpu.memory_space<vmem>>, vector<2x8x8x128xf32>,
    return
  }
}

</mosaic_0001>

<bundles_post_ra>
// kernel: basic_block_forward.1
= control target key start
LH: loop header
LB: loop body
LE: loop exit
PB: predicated region body
PF: predicated region fallthrough
CT: control target
= control target key end

     0   :  { %12 = vsyncpa [#allocation3], 0  ;;  %s5388_s0 = inlined_call_operand.hbm [shape: f32[2,8,8,128], index: 0, kind: input, shape index: {}]   ;;  %s5389_s1 = inlined_call_operand.hbm [shape: bf16[384,384], index: 1, kind: input, shape index: {}]   ;;  %s5390_s2 = inlined_call_operand.vmem [shape: f32[1,128], index: 2, kind: input, shape index: {}]   ;;  %s5391_s3 = inlined_call_operand.vmem [shape: f32[1,128], index: 3, kind: input, shape index: {}]   ;;  %s5392_s4 = inlined_call_operand.hbm [shape: bf16[384,384], index: 4, kind: input, shape index: {}]   ;;  %s5393_s5 = inlined_call_operand.vmem [shape: f32[1,128], index: 5, kind: input, shape index: {}]   ;;  %s5394_s6 = inlined_call_operand.vmem [shape: f32[1,128], index: 6, kind: input, shape index: {}]   ;;  %s5395_s7 = inlined_call_operand.hbm [shape: f32[2,8,8,128], index: 7, kind: output, shape index: {}]  }
   0x1   :  { %13 = vsyncpa [#allocation6], 0 }
   0x2   :  { %14 = vsyncpa [#allocation4], 0  ;;  %s4130_s24 = smov [#allocation5]   ;;  %s4036_s28 = scalar_lea.hbm %s5389_s1, 9216 }
   0x3   :  { %s32_s25 = sshll.u32 %s4130_s24, 4  ;;  %p4037_p0 = scmp.ne.s32.totalorder %s5389_s1, %s4036_s28  ;;  %s33_s25 = int_to_ptr.vmem [resolvable:$true] %s32_s25 }
   0x4   :  { %p4040_p1 = scmp.lt.u32.totalorder %s4036_s28, %s5389_s1 }
   0x6   :  { %p4042_p2 = pnand %p4040_p1, %p4037_p0 }
   0x8   :  { %4045 = shalt.err (!%p4042_p2)
}
   0x9   :  { %s4046_s10 = scalar_lea.vmem %s33_s25, 9216  ;;  %p4051_p4 = scmp.lt.s32.totalorder %s33_s25, %s33_s25 }
   0xa   :  { %p4047_p3 = scmp.ne.s32.totalorder %s33_s25, %s4046_s10  ;;  %p4052_p5 = scmp.lt.s32.totalorder %s4046_s10, %s4046_s10 }
   0xc   :  { %p4053_p6 = por %p4052_p5, %p4051_p4 }
   0xe   :  { %p4054_p7 = pnand %p4053_p6, %p4047_p3 }
  0x10   :  { %4057 = shalt.err (!%p4054_p7)
}
  0x11   :  { %s4131_s11 = smov 192   ;;  %s4132_s12 = smov 12  }
  0x12   :  { %38 = dma.hbm_to_vmem [thread:$0]  %s5389_s1, 9216, %s33_s25, [#allocation6], %s4131_s11, %s4131_s11, %s4132_s12  }
  0x13   :  { %s4133_s15 = smov [#allocation2]   ;;  %s4058_s19 = scalar_lea.hbm %s5388_s0, 2048 }
  0x14   :  { %s20_s16 = sshll.u32 %s4133_s15, 4  ;;  %p4059_p8 = scmp.ne.s32.totalorder %s5388_s0, %s4058_s19  ;;  %s21_s16 = int_to_ptr.vmem [resolvable:$true] %s20_s16 }
  0x15   :  { %p4062_p9 = scmp.lt.u32.totalorder %s4058_s19, %s5388_s0 }
  0x17   :  { %p4064_p10 = pnand %p4062_p9, %p4059_p8 }
  0x19   :  { %4067 = shalt.err (!%p4064_p10)
}
  0x1a   :  { %s4068_s24 = scalar_lea.vmem %s21_s16, 2048  ;;  %p4073_p12 = scmp.lt.s32.totalorder %s21_s16, %s21_s16 }
  0x1b   :  { %p4069_p11 = scmp.ne.s32.totalorder %s21_s16, %s4068_s24  ;;  %p4074_p13 = scmp.lt.s32.totalorder %s4068_s24, %s4068_s24 }
  0x1d   :  { %p4075_p0 = por %p4074_p13, %p4073_p12 }
  0x1f   :  { %p4076_p1 = pnand %p4075_p0, %p4069_p11 }
  0x21   :  { %4079 = shalt.err (!%p4076_p1)
}
  0x22   :  { %s4134_s1 = smov 128   ;;  %s4135_s25 = smov 8  }
  0x23   :  { %26 = dma.hbm_to_vmem [thread:$0]  %s5388_s0, 2048, %s21_s16, [#allocation3], %s4134_s1, %s4134_s1, %s4135_s25  }
  0x24   :  { %s4136_s28 = smov [#allocation7]   ;;  %s4080_s9 = scalar_lea.hbm %s5392_s4, 9216 }
  0x25   :  { %s48_s29 = sshll.u32 %s4136_s28, 4  ;;  %p4081_p2 = scmp.ne.s32.totalorder %s5392_s4, %s4080_s9  ;;  %s49_s29 = int_to_ptr.vmem [resolvable:$true] %s48_s29 }
  0x26   :  { %p4084_p3 = scmp.lt.u32.totalorder %s4080_s9, %s5392_s4 }
  0x28   :  { %p4086_p4 = pnand %p4084_p3, %p4081_p2 }
  0x2a   :  { %4089 = shalt.err (!%p4086_p4)
}
  0x2b   :  { %s4090_s17 = scalar_lea.vmem %s49_s29, 9216  ;;  %p4095_p6 = scmp.lt.s32.totalorder %s49_s29, %s49_s29 }
  0x2c   :  { %p4091_p5 = scmp.ne.s32.totalorder %s49_s29, %s4090_s17  ;;  %p4096_p7 = scmp.lt.s32.totalorder %s4090_s17, %s4090_s17 }
  0x2e   :  { %p4097_p8 = por %p4096_p7, %p4095_p6 }
  0x30   :  { %p4098_p9 = pnand %p4097_p8, %p4091_p5 }
  0x32   :  { %4101 = shalt.err (!%p4098_p9)
}
  0x33   :  { %54 = dma.hbm_to_vmem [thread:$0]  %s5392_s4, 9216, %s49_s29, [#allocation6], %s4131_s11, %s4131_s11, %s4132_s12  }
  0x34   :  { %4124 = dma.done.wait [#allocation3], 2048  }
  0x35   :  { %4125 = vsyncadd [#allocation3], 4294965248 }
  0x36   :  { %4126 = dma.done.wait [#allocation6], 18432  }
  0x37   :  { %4127 = vsyncadd [#allocation6], 4294948864  ;;  %v3824_v0 = vld [vmem:[#allocation5 + $0x4] ss:$12 sps:$4 sm:$0xff]   ;;  %v3826_v1 = vld [vmem:[#allocation5 + $0xc8] ss:$12 sps:$4 sm:$0xff]   ;;  %v85_v12 = vlaneseq }
  0x38   :  { %1152 = vmatprep.subr.bf16.mxu0 %v3824_v0  ;;  %v3827_v2 = vld [vmem:[#allocation5] ss:$12 sps:$4 sm:$0xff]   ;;  %3527 = vmatprep.subr.bf16.mxu1 %v3826_v1  ;;  %v3828_v3 = vld [vmem:[#allocation5 + $0x8] ss:$12 sps:$4 sm:$0xff]   ;;  %v3832_v6 = vld [vmem:[#allocation5 + $0x18] ss:$12 sps:$4 sm:$0xff]  }
  0x39   :  { %1153 = vmatpush1.bf16.msra.mxu0 %v3827_v2  ;;  %v3829_v4 = vld [vmem:[#allocation5 + $0x1c] ss:$12 sps:$4 sm:$0xff]   ;;  %3528 = vmatpush3.bf16.msra.mxu1 %v3828_v3  ;;  %v3831_v5 = vld [vmem:[#allocation5 + $0xe0] ss:$12 sps:$4 sm:$0xff]   ;;  %v3836_v9 = vld [vmem:[#allocation5 + $0xf8] ss:$12 sps:$4 sm:$0xff]  }
  0x3a   :  { %1154 = vmatprep.subr.bf16.mxu0 %v3829_v4  ;;  %v3833_v7 = vld [vmem:[#allocation5 + $0x20] ss:$12 sps:$4 sm:$0xff]   ;;  %3529 = vmatprep.subr.bf16.mxu1 %v3831_v5  ;;  %v3837_v10 = vld [vmem:[#allocation5 + $0x30] ss:$12 sps:$4 sm:$0xff]   ;;  %v3838_v11 = vld [vmem:[#allocation5 + $0x38] ss:$12 sps:$4 sm:$0xff]  }
  0x3b   :  { %v3834_v8 = vld [vmem:[#allocation5 + $0x34] ss:$12 sps:$4 sm:$0xff]   ;;  %v3839_v13 = vld [vmem:[#allocation5 + $0x4c] ss:$12 sps:$4 sm:$0xff]   ;;  %v3841_v14 = vld [vmem:[#allocation5 + $0x110] ss:$12 sps:$4 sm:$0xff]  }
  0x3c   :  { %v3842_v15 = vld [vmem:[#allocation5 + $0x48] ss:$12 sps:$4 sm:$0xff]   ;;  %v3843_v16 = vld [vmem:[#allocation5 + $0x50] ss:$12 sps:$4 sm:$0xff]   ;;  %v4224_v17 = vshrl.u32 %v85_v12, 7  ;;  %v4231_v35 = vld [vmem:[#allocation2] sm:$0xff] }
  0x3d   :  { %1155 = vmatpush1.bf16.msra.mxu0 %v3832_v6  ;;  %3530 = vmatpush3.bf16.msra.mxu1 %v3833_v7  ;;  %v3844_v18 = vld [vmem:[#allocation5 + $0x64] ss:$12 sps:$4 sm:$0xff]   ;;  %v3846_v19 = vld [vmem:[#allocation5 + $0x128] ss:$12 sps:$4 sm:$0xff]   ;;  %v3847_v20 = vld [vmem:[#allocation5 + $0x60] ss:$12 sps:$4 sm:$0xff]  }
  0x3e   :  { %1156 = vmatprep.subr.bf16.mxu0 %v3834_v8  ;;  %3531 = vmatprep.subr.bf16.mxu1 %v3836_v9  ;;  %v3848_v21 = vld [vmem:[#allocation5 + $0x68] ss:$12 sps:$4 sm:$0xff]   ;;  %v3851_v23 = vld [vmem:[#allocation5 + $0x140] ss:$12 sps:$4 sm:$0xff]   ;;  %v4227_v24 = vadd.s32 8, %v4224_v17  ;;  %v106_v29 = vand.u32 7, %v4224_v17 }
  0x3f   :  { %v3849_v22 = vld [vmem:[#allocation5 + $0x7c] ss:$12 sps:$4 sm:$0xff]   ;;  %v3852_v25 = vld [vmem:[#allocation5 + $0x78] ss:$12 sps:$4 sm:$0xff]   ;;  %v3853_v26 = vld [vmem:[#allocation5 + $0x80] ss:$12 sps:$4 sm:$0xff]  }
  0x40   :  { %v3854_v27 = vld [vmem:[#allocation5 + $0x94] ss:$12 sps:$4 sm:$0xff]   ;;  %v3856_v28 = vld [vmem:[#allocation5 + $0x158] ss:$12 sps:$4 sm:$0xff]   ;;  %v113_v30 = vand.u32 7, %v4227_v24  ;;  %v4233_v36 = vld [vmem:[#allocation2 + $0x8] sm:$0xff] }
  0x41   :  { %1157 = vmatpush1.bf16.msra.mxu0 %v3837_v10  ;;  %3532 = vmatpush3.bf16.msra.mxu1 %v3838_v11  ;;  %v3857_v31 = vld [vmem:[#allocation5 + $0x90] ss:$12 sps:$4 sm:$0xff]   ;;  %v3858_v32 = vld [vmem:[#allocation5 + $0x98] ss:$12 sps:$4 sm:$0xff]   ;;  %v550_v37 = vrot.slane %v4231_v35, 7  ;;  %vm5412_vm0 = vcmp.lt.s32.totalorder %v4224_v17, 1  ;;  %v656_v42 = vpack.c.bf16 %v4233_v36, %v4231_v35 }
  0x42   :  { %1158 = vmatprep.subr.bf16.mxu0 %v3839_v13  ;;  %3533 = vmatprep.subr.bf16.mxu1 %v3841_v14  ;;  %v3859_v33 = vld [vmem:[#allocation5 + $0xac] ss:$12 sps:$4 sm:$0xff]   ;;  %v3861_v34 = vld [vmem:[#allocation5 + $0x170] ss:$12 sps:$4 sm:$0xff]   ;;  %vm4239_vm1 = vcmp.ne.s32.totalorder %v106_v29, 0  ;;  %v551_v41 = vrot.slane %v4233_v36, 7 }
  0x43   :  { %v3862_v39 = vld [vmem:[#allocation5 + $0xa8] ss:$12 sps:$4 sm:$0xff]   ;;  %v3863_v40 = vld [vmem:[#allocation5 + $0xb0] ss:$12 sps:$4 sm:$0xff]   ;;  %vm3495_vm2 = vcmp.ne.s32.totalorder %v113_v30, 0  ;;  %1410 = vmatprep.mubr.bf16.mxu1 %v656_v42  ;;  %v4256_v48 = vadd.s32 16, %v4224_v17  ;;  %1184 = vmatprep.mubr.bf16.mxu0 %v656_v42 }
  0x44   :  { %v4246_v43 = vld [vmem:[#allocation2 + $0x78] sm:$0xff]  ;;  %v3864_v44 = vld [vmem:[#allocation5 + $0xc4] ss:$12 sps:$4 sm:$0xff]   ;;  %v581_v46 = vsel %vm5412_vm0, %v550_v37, %v551_v41  ;;  %v4259_v49 = vadd.s32 24, %v4224_v17  ;;  %vm4269_vm3 = vmpackc.low %vm3495_vm2, %vm4239_vm1  ;;  %v4292_v1 = vadd.s32 32, %v4224_v17  ;;  %v4303_v4 = vadd.s32 40, %v4224_v17 }
  0x45   :  { %1159 = vmatpush1.bf16.msra.mxu0 %v3842_v15  ;;  %3534 = vmatpush3.bf16.msra.mxu1 %v3843_v16  ;;  %v5404_v45 = vrot.slane %v4246_v43, 7  ;;  %v4253_v47 = vld [vmem:[#allocation2 + $0x10] sm:$0xff]  ;;  %v4265_v51 = vld [vmem:[#allocation2 + $0x18] sm:$0xff]  ;;  %v3866_v54 = vld [vmem:[#allocation5 + $0xc0] ss:$12 sps:$4 sm:$0xff]   ;;  %v5405_v59 = vand.u32 7, %v4256_v48 }
  0x46   :  { %1160 = vmatprep.subr.bf16.mxu0 %v3844_v18  ;;  %3535 = vmatprep.subr.bf16.mxu1 %v3846_v19  ;;  %v3867_v55 = vld [vmem:[#allocation5 + $0xdc] ss:$12 sps:$4 sm:$0xff]   ;;  %v552_v56 = vrot.slane %v4253_v47, 7  ;;  %v553_v57 = vrot.slane %v4265_v51, 7  ;;  %v4279_v58 = vpack.c.bf16 %v4265_v51, %v4253_v47  ;;  %v5409_v60 = vand.u32 7, %v4259_v49  ;;  %v4298_v2 = vld [vmem:[#allocation2 + $0x20] sm:$0xff] }
  0x47   :  { %v582_v50 = vsel %vm5412_vm0, %v5404_v45, %v550_v37  ;;  %v3869_v61 = vld [vmem:[#allocation5 + $0xd8] ss:$12 sps:$4 sm:$0xff]   ;;  %v3870_v62 = vld [vmem:[#allocation5 + $0xf4] ss:$12 sps:$4 sm:$0xff]   ;;  %vm3498_vm5 = vcmp.ne.s32.totalorder %v5405_v59, 0  ;;  %v4300_v3 = vld [vmem:[#allocation2 + $0x28] sm:$0xff] }
  0x48   :  { %v4273_v53 = vpack.c.bf16 %v581_v46, %v582_v50  ;;  %v579_v63 = vsel %vm5412_vm0, %v552_v56, %v553_v57  ;;  %v580_v0 = vsel %vm5412_vm0, %v551_v41, %v552_v56  ;;  %vm3497_vm4 = vcmp.ne.s32.totalorder %v5409_v60, 0  ;;  %v3872_v6 = vld [vmem:[#allocation5 + $0xf0] ss:$12 sps:$4 sm:$0xff]   ;;  %v3873_v8 = vld [vmem:[#allocation5 + $0x10c] ss:$12 sps:$4 sm:$0xff]  }
  0x49   :  { %1161 = vmatpush1.bf16.msra.mxu0 %v3847_v20  ;;  %3536 = vmatpush3.bf16.msra.mxu1 %v3848_v21  ;;  %v4305_v5 = vpack.c.bf16 %v579_v63, %v580_v0  ;;  %vm4307_vm6 = vmpackc.low %vm3497_vm4, %vm3498_vm5  ;;  %v5428_v7 = vmov 0  ;;  %v554_v9 = vrot.slane %v4298_v2, 7  ;;  %v555_v10 = vrot.slane %v4300_v3, 7  ;;  %v3875_v14 = vld [vmem:[#allocation5 + $0x108] ss:$12 sps:$4 sm:$0xff]  }
  0x4a   :  { %1162 = vmatprep.subr.bf16.mxu0 %v3849_v22  ;;  %3537 = vmatprep.subr.bf16.mxu1 %v3851_v23  ;;  %v5429_v7 = vsel %vm4307_vm6, 4294967295, %v5428_v7  ;;  %v4315_v11 = vpack.c.bf16 %v4300_v3, %v4298_v2  ;;  %v5402_v12 = vand.u32 7, %v4292_v1  ;;  %v5403_v13 = vand.u32 7, %v4303_v4  ;;  %v3876_v15 = vld [vmem:[#allocation5 + $0x124] ss:$12 sps:$4 sm:$0xff]  }
  0x4b   :  { %5430 = vst [vmem:[#allocation12_spill] sm:$0xff] %v5429_v7  ;;  %v4320_v16 = vadd.s32 48, %v4224_v17  ;;  %v4323_v18 = vadd.s32 56, %v4224_v17  ;;  %v3891_v19 = vld [vmem:[#allocation5 + $0x188] ss:$12 sps:$4 sm:$0xff]   ;;  %v577_v20 = vsel %vm5412_vm0, %v554_v9, %v555_v10  ;;  %v578_v21 = vsel %vm5412_vm0, %v553_v57, %v554_v9  ;;  %v4381_v57 = vld [vmem:[#allocation2 + $0x40] sm:$0xff] }
  0x4c   :  { %v3892_v22 = vld [vmem:[#allocation5 + $0x1a0] ss:$12 sps:$4 sm:$0xff]   ;;  %vm3499_vm7 = vcmp.ne.s32.totalorder %v5403_v13, 0  ;;  %vm3500_vm8 = vcmp.ne.s32.totalorder %v5402_v12, 0  ;;  %v4337_v23 = vld [vmem:[#allocation2 + $0x30] sm:$0xff]  ;;  %v4368_v42 = vadd.s32 64, %v4224_v17 }
  0x4d   :  { %1163 = vmatpush1.bf16.msra.mxu0 %v3852_v25  ;;  %3538 = vmatpush3.bf16.msra.mxu1 %v3853_v26  ;;  %v4339_v25 = vld [vmem:[#allocation2 + $0x38] sm:$0xff]  ;;  %v5400_v26 = vand.u32 7, %v4320_v16  ;;  %vm4345_vm9 = vmpackc.low %vm3499_vm7, %vm3500_vm8  ;;  %v4389_v63 = vadd.s32 88, %v4224_v17  ;;  %v3908_v24 = vld [vmem:[#allocation5 + $0x1e0] ss:$12 sps:$4 sm:$0xff]  }
  0x4e   :  { %1164 = vmatprep.subr.bf16.mxu0 %v3854_v27  ;;  %3539 = vmatprep.subr.bf16.mxu1 %v3856_v28  ;;  %v5401_v27 = vand.u32 7, %v4323_v18  ;;  %v4343_v28 = vpack.c.bf16 %v577_v20, %v578_v21  ;;  %v557_v37 = vrot.slane %v4339_v25, 7  ;;  %v4353_v38 = vpack.c.bf16 %v4339_v25, %v4337_v23  ;;  %v3881_v46 = vld [vmem:[#allocation5 + $0x138] ss:$12 sps:$4 sm:$0xff]   ;;  %v3897_v50 = vld [vmem:[#allocation5 + $0x1d0] ss:$12 sps:$4 sm:$0xff]  }
  0x4f   :  { %vm4363_vm11 = vcmp.ne.s32.totalorder %v5400_v26, 0  ;;  %v5398_v0 = vand.u32 7, %v4368_v42  ;;  %v3884_v9 = vld [vmem:[#allocation5 + $0x150] ss:$12 sps:$4 sm:$0xff]   ;;  %v4471_v26 = vadd.s32 112, %v4224_v17 }
  0x50   :  { %vm4357_vm10 = vcmp.ne.s32.totalorder %v5401_v27, 0  ;;  %v4478_v27 = vld [vmem:[#allocation2 + $0x68] sm:$0xff]  ;;  %v3907_v12 = vld [vmem:[#allocation5 + $0x230] ss:$12 sps:$4 sm:$0xff]  }
  0x51   :  { %1165 = vmatpush1.bf16.msra.mxu0 %v3857_v31  ;;  %3540 = vmatpush3.bf16.msra.mxu1 %v3858_v32  ;;  %v3878_v31 = vld [vmem:[#allocation5 + $0x120] ss:$12 sps:$4 sm:$0xff]   ;;  %v3879_v32 = vld [vmem:[#allocation5 + $0x13c] ss:$12 sps:$4 sm:$0xff]   ;;  %vm4399_vm12 = vmpackc.low %vm4357_vm10, %vm4363_vm11  ;;  %vm4416_vm13 = vcmp.ne.s32.totalorder %v5398_v0, 0  ;;  %v5408_v45 = vand.u32 7, %v4471_v26 }
  0x52   :  { %1166 = vmatprep.subr.bf16.mxu0 %v3859_v33  ;;  %3541 = vmatprep.subr.bf16.mxu1 %v3861_v34  ;;  %v5431_v33 = vmov 0  ;;  %v556_v34 = vrot.slane %v4337_v23, 7  ;;  %v3898_v13 = vld [vmem:[#allocation5 + $0x1b0] ss:$12 sps:$4 sm:$0xff]   ;;  %vm5415_vm10 = vcmp.lt.s32.totalorder %v4224_v17, 7 }
  0x53   :  { %v5432_v33 = vsel %vm4345_vm9, 4294967295, %v5431_v33  ;;  %vm4525_vm11 = vcmp.ne.s32.totalorder %v5408_v45, 0  ;;  %v3913_v60 = vld [vmem:[#allocation5 + $0x1fc] ss:$12 sps:$4 sm:$0xff]  }
  0x54   :  { %v576_v56 = vsel %vm5412_vm0, %v555_v10, %v556_v34  ;;  %v3885_v10 = vld [vmem:[#allocation5 + $0x16c] ss:$12 sps:$4 sm:$0xff]  }
  0x55   :  { %1167 = vmatpush1.bf16.msra.mxu0 %v3862_v39  ;;  %3542 = vmatpush3.bf16.msra.mxu1 %v3863_v40  ;;  %v3896_v39 = vld [vmem:[#allocation5 + $0x1b8] ss:$12 sps:$4 sm:$0xff]  }
  0x56   :  { %1168 = vmatprep.subr.bf16.mxu0 %v3864_v44  ;;  %3687 = vmatprep.subr.bf16.mxu1 %v3891_v19  ;;  %v4371_v44 = vadd.s32 72, %v4224_v17  ;;  %v3890_v40 = vld [vmem:[#allocation5 + $0x184] ss:$12 sps:$4 sm:$0xff]  }
  0x58   :  { %3187 = vmatmul.mubr.msk.bf16.vlgmr.msra.gmra.mrb[0].mxu1 %vm4269_vm3, %v4273_v53 }
  0x59   :  { %1169 = vmatpush1.bf16.msra.mxu0 %v3866_v54  ;;  %1418 = vmatprep.mubr.bf16.mxu1 %v4279_v58  ;;  %v3882_v54 = vld [vmem:[#allocation5 + $0x154] ss:$12 sps:$4 sm:$0xff]  }
  0x5a   :  { %1170 = vmatprep.subr.bf16.mxu0 %v3867_v55  ;;  %3688 = vmatpush3.bf16.msra.mxu1 %v3891_v19  ;;  %v575_v55 = vsel %vm5412_vm0, %v556_v34, %v557_v37  ;;  %v3893_v34 = vld [vmem:[#allocation5 + $0x198] ss:$12 sps:$4 sm:$0xff]  }
  0x5b   :  { %3689 = vmatprep.subr.bf16.mxu1 %v3892_v22 }
  0x5d   :  { %1171 = vmatpush1.bf16.msra.mxu0 %v3869_v61  ;;  %v4383_v61 = vld [vmem:[#allocation2 + $0x48] sm:$0xff] }
  0x5e   :  { %1172 = vmatprep.subr.bf16.mxu0 %v3870_v62  ;;  %3690 = vmatpush3.bf16.msra.mxu1 %v3892_v22  ;;  %v4386_v62 = vadd.s32 80, %v4224_v17  ;;  %v559_v19 = vrot.slane %v4383_v61, 7  ;;  %v4407_v20 = vpack.c.bf16 %v4383_v61, %v4381_v57  ;;  %v5396_v22 = vand.u32 7, %v4389_v63 }
  0x5f   :  { %3691 = vmatprep.subr.bf16.mxu1 %v3896_v39 }
  0x60   :  { %3192 = vmatmul.mubr.msk.bf16.gmra.mrb[4].mxu1 %vm4307_vm6, %v4305_v5  ;;  %v5397_v21 = vand.u32 7, %v4386_v62  ;;  %vm4436_vm15 = vcmp.ne.s32.totalorder %v5396_v22, 0 }
  0x61   :  { %1173 = vmatpush1.bf16.msra.mxu0 %v3872_v6  ;;  %1426 = vmatprep.mubr.bf16.mxu1 %v4315_v11  ;;  %v5399_v6 = vand.u32 7, %v4371_v44 }
  0x62   :  { %1174 = vmatprep.subr.bf16.mxu0 %v3873_v8  ;;  %3692 = vmatpush3.bf16.msra.mxu1 %v3896_v39  ;;  %v4393_v8 = vpack.c.bf16 %v575_v55, %v576_v56  ;;  %v3902_v39 = vld [vmem:[#allocation5 + $0x200] ss:$12 sps:$4 sm:$0xff]   ;;  %v4432_v55 = vld [vmem:[#allocation2 + $0x58] sm:$0xff]  ;;  %vm3506_vm1 = vcmp.ne.s32.totalorder %v5397_v21, 0 }
  0x63   :  { %3693 = vmatprep.subr.bf16.mxu1 %v3897_v50  ;;  %vm3503_vm14 = vcmp.ne.s32.totalorder %v5399_v6, 0  ;;  %v561_v21 = vrot.slane %v4432_v55, 7  ;;  %vm4461_vm4 = vmpackc.low %vm4436_vm15, %vm3506_vm1  ;;  %v3900_v6 = vld [vmem:[#allocation5 + $0x1b4] ss:$12 sps:$4 sm:$0xff]   ;;  %vm3512_vm15 = vcmp.ne.s32.totalorder %v106_v29, 7  ;;  %v600_v29 = vrot.slane %v4233_v36, 1 }
  0x64   :  { %vm4447_vm2 = vmpackc.low %vm3503_vm14, %vm4416_vm13  ;;  %v4476_v56 = vld [vmem:[#allocation2 + $0x60] sm:$0xff]  ;;  %vm4531_vm13 = vcmp.ne.s32.totalorder %v113_v30, 7  ;;  %v599_v30 = vrot.slane %v4231_v35, 1  ;;  %v5462_v36 = vand.u32 7, %v4256_v48 }
  0x65   :  { %1175 = vmatpush1.bf16.msra.mxu0 %v3875_v14  ;;  %v5437_v14 = vmov 0 }
  0x66   :  { %1176 = vmatprep.subr.bf16.mxu0 %v3876_v15  ;;  %v5438_v14 = vsel %vm4399_vm12, 4294967295, %v5437_v14  ;;  %v558_v15 = vrot.slane %v4381_v57, 7  ;;  %3694 = vmatpush3.bf16.msra.mxu1 %v3897_v50  ;;  %v4428_v50 = vadd.s32 96, %v4224_v17 }
  0x68   :  { %3197 = vmatmul.mubr.msk.bf16.gmra.mrb[8].mxu1 %vm4345_vm9, %v4343_v28  ;;  %v573_v41 = vsel %vm5412_vm0, %v558_v15, %v559_v19 }
  0x69   :  { %1177 = vmatpush1.bf16.msra.mxu0 %v3878_v31  ;;  %1434 = vmatprep.mubr.bf16.mxu1 %v4353_v38  ;;  %v3901_v31 = vld [vmem:[#allocation5 + $0x1e8] ss:$12 sps:$4 sm:$0xff]  }
  0x6a   :  { %1178 = vmatprep.subr.bf16.mxu0 %v3879_v32  ;;  %v3887_v32 = vld [vmem:[#allocation5 + $0x168] ss:$12 sps:$4 sm:$0xff]   ;;  %3695 = vmatprep.subr.bf16.mxu1 %v3901_v31 }
  0x6b   :  { %3696 = vmatpush3.bf16.msra.mxu1 %v3901_v31  ;;  %v3895_v31 = vld [vmem:[#allocation5 + $0x19c] ss:$12 sps:$4 sm:$0xff]  }
  0x6c   :  { %3697 = vmatprep.subr.bf16.mxu1 %v3902_v39 }
  0x6d   :  { %1179 = vmatpush1.bf16.msra.mxu0 %v3881_v46  ;;  %v574_v46 = vsel %vm5412_vm0, %v557_v37, %v558_v15  ;;  %v4443_v37 = vadd.s32 104, %v4224_v17 }
  0x6e   :  { %1180 = vmatprep.subr.bf16.mxu0 %v3882_v54  ;;  %v4430_v54 = vld [vmem:[#allocation2 + $0x50] sm:$0xff]  ;;  %v4451_v15 = vpack.c.bf16 %v573_v41, %v574_v46  ;;  %v5406_v41 = vand.u32 7, %v4428_v50  ;;  %v3906_v46 = vld [vmem:[#allocation5 + $0x218] ss:$12 sps:$4 sm:$0xff]  }
  0x6f   :  { %v560_v22 = vrot.slane %v4430_v54, 7  ;;  %v4457_v0 = vpack.c.bf16 %v4432_v55, %v4430_v54  ;;  %3698 = vmatpush3.bf16.msra.mxu1 %v3902_v39 }
  0x70   :  { %3202 = vmatmul.mubr.msk.bf16.gmra.mrb[12].mxu1 %vm4399_vm12, %v4393_v8  ;;  %vm3508_vm7 = vcmp.ne.s32.totalorder %v5406_v41, 0  ;;  %3699 = vmatprep.subr.bf16.mxu1 %v3906_v46  ;;  %v4504_v41 = vpack.c.bf16 %v4478_v27, %v4476_v56 }
  0x71   :  { %1181 = vmatpush1.bf16.msra.mxu0 %v3884_v9  ;;  %1442 = vmatprep.mubr.bf16.mxu1 %v4407_v20  ;;  %v3888_v9 = vld [vmem:[#allocation5 + $0x180] ss:$12 sps:$4 sm:$0xff]   ;;  %v572_v39 = vsel %vm5412_vm0, %v559_v19, %v560_v22 }
  0x72   :  { %1182 = vmatprep.subr.bf16.mxu0 %v3885_v10  ;;  %v5443_v10 = vmov 0  ;;  %v3905_v19 = vld [vmem:[#allocation5 + $0x1cc] ss:$12 sps:$4 sm:$0xff]  }
  0x73   :  { %v5444_v10 = vsel %vm4447_vm2, 4294967295, %v5443_v10  ;;  %3700 = vmatpush3.bf16.msra.mxu1 %v3906_v46 }
  0x74   :  { %3701 = vmatprep.subr.bf16.mxu1 %v3907_v12 }
  0x75   :  { %1183 = vmatpush1.bf16.msra.mxu0 %v3887_v32  ;;  %v5445_v32 = vmov 0 }
  0x76   :  { %1265 = vmatprep.subr.bf16.mxu0 %v3890_v40  ;;  %v5446_v32 = vsel %vm4461_vm4, 4294967295, %v5445_v32  ;;  %v5407_v40 = vand.u32 7, %v4443_v37 }
  0x77   :  { %3702 = vmatpush3.bf16.msra.mxu1 %v3907_v12  ;;  %v3910_v12 = vld [vmem:[#allocation5 + $0x1e4] ss:$12 sps:$4 sm:$0xff]  }
  0x78   :  { %3107 = vmatmul.mubr.msk.bf16.vlgmr.msra.gmra.mrb[0].mxu0 %vm4269_vm3, %v4273_v53  ;;  %3207 = vmatmul.mubr.msk.bf16.gmra.mrb[16].mxu1 %vm4447_vm2, %v4451_v15  ;;  %v571_v53 = vsel %vm5412_vm0, %v560_v22, %v561_v21  ;;  %vm4488_vm5 = vcmp.ne.s32.totalorder %v5407_v40, 0  ;;  %v562_v22 = vrot.slane %v4476_v56, 7 }
  0x79   :  { %1266 = vmatpush1.bf16.msra.mxu0 %v3888_v9  ;;  %1194 = vmatprep.mubr.bf16.mxu0 %v4279_v58  ;;  %v4495_v58 = vadd.s32 120, %v4224_v17  ;;  %v4498_v59 = vpack.c.bf16 %v571_v53, %v572_v39  ;;  %vm4508_vm8 = vmpackc.low %vm4488_vm5, %vm3508_vm7  ;;  %v3903_v53 = vld [vmem:[#allocation5 + $0x1c8] ss:$12 sps:$4 sm:$0xff]  }
  0x7a   :  { %1450 = vmatprep.mubr.bf16.mxu1 %v4457_v0  ;;  %1267 = vmatprep.subr.bf16.mxu0 %v3895_v31  ;;  %v563_v31 = vrot.slane %v4478_v27, 7  ;;  %vm4562_vm5 = vmpackc.low %vm4531_vm13, %vm3512_vm15 }
  0x7b   :  { %v211_v46 = vand.u32 7, %v4495_v58 }
  0x7c   :  { %v569_v39 = vsel %vm5412_vm0, %v562_v22, %v563_v31 }
  0x7d   :  { %1268 = vmatpush1.bf16.msra.mxu0 %v3893_v34  ;;  %v4516_v34 = vld [vmem:[#allocation2 + $0x70] sm:$0xff]  ;;  %vm3509_vm14 = vcmp.ne.s32.totalorder %v211_v46, 0 }
  0x7e   :  { %1269 = vmatprep.subr.bf16.mxu0 %v3900_v6  ;;  %v564_v45 = vrot.slane %v4516_v34, 7  ;;  %v4550_v7 = vpack.c.bf16 %v4246_v43, %v4516_v34  ;;  %vm4554_vm1 = vmpackc.low %vm3509_vm14, %vm4525_vm11  ;;  %v5459_v6 = vand.u32 7, %v4259_v49  ;;  %vm4577_vm11 = vcmp.ne.s32.totalorder %v5462_v36, 7 }
  0x7f   :  { %v5465_v49 = vrot.slane %v4246_v43, 7 }
  0x80   :  { %3112 = vmatmul.mubr.msk.bf16.gmra.mrb[4].mxu0 %vm4307_vm6, %v4305_v5  ;;  %3212 = vmatmul.mubr.msk.bf16.gmra.mrb[20].mxu1 %vm4461_vm4, %v4498_v59  ;;  %vm4571_vm7 = vcmp.ne.s32.totalorder %v5459_v6, 7  ;;  %v568_v48 = vsel %vm5412_vm0, %v563_v31, %v564_v45  ;;  %v3914_v6 = vld [vmem:[#allocation5 + $0x210] ss:$12 sps:$4 sm:$0xff]   ;;  %v602_v31 = vrot.slane %v4265_v51, 1  ;;  %v3917_v51 = vld [vmem:[#allocation5 + $0x228] ss:$12 sps:$4 sm:$0xff]  }
  0x81   :  { %1204 = vmatprep.mubr.bf16.mxu0 %v4315_v11  ;;  %1458 = vmatprep.mubr.bf16.mxu1 %v4504_v41  ;;  %v570_v11 = vsel %vm5412_vm0, %v561_v21, %v562_v22  ;;  %v601_v21 = vrot.slane %v4253_v47, 1  ;;  %v3911_v22 = vld [vmem:[#allocation5 + $0x1f8] ss:$12 sps:$4 sm:$0xff]   ;;  %v567_v5 = vsel %vm5412_vm0, %v564_v45, %v5465_v49  ;;  %vm4612_vm15 = vmpackc.low %vm4571_vm7, %vm4577_vm11  ;;  %v609_v47 = vrot.slane %v4430_v54, 1 }
  0x82   :  { %1270 = vmatpush1.bf16.msra.mxu0 %v3898_v13  ;;  %v4545_v9 = vpack.c.bf16 %v569_v39, %v570_v11  ;;  %v5466_v39 = vand.u32 7, %v4303_v4  ;;  %v5467_v11 = vand.u32 7, %v4292_v1  ;;  %v4602_v36 = vpack.c.bf16 %v567_v5, %v568_v48  ;;  %v3919_v45 = vld [vmem:[#allocation5 + $0x22c] ss:$12 sps:$4 sm:$0xff]  }
  0x83   :  { %1271 = vmatprep.subr.bf16.mxu0 %v3905_v19  ;;  %v604_v1 = vrot.slane %v4300_v3, 1  ;;  %v605_v4 = vrot.slane %v4337_v23, 1  ;;  %v5473_v54 = vand.u32 7, %v4320_v16  ;;  %v5474_v5 = vand.u32 7, %v4371_v44 }
  0x84   :  { %vm3515_vm13 = vcmp.ne.s32.totalorder %v5466_v39, 7  ;;  %vm3516_vm14 = vcmp.ne.s32.totalorder %v5467_v11, 7  ;;  %v5475_v48 = vand.u32 7, %v4368_v42  ;;  %v612_v11 = vrot.slane %v4478_v27, 1 }
  0x85   :  { %vm4618_vm0 = vmpackc.low %vm3515_vm13, %vm3516_vm14  ;;  %v625_v23 = vsel %vm5415_vm10, %v604_v1, %v605_v4  ;;  %vm3518_vm11 = vcmp.ne.s32.totalorder %v5473_v54, 7  ;;  %vm3519_vm13 = vcmp.ne.s32.totalorder %v5474_v5, 7 }
  0x86   :  { %1272 = vmatpush1.bf16.msra.mxu0 %v3903_v53  ;;  %v608_v53 = vrot.slane %v4383_v61, 1  ;;  %v5472_v61 = vand.u32 7, %v4323_v18  ;;  %vm3520_vm14 = vcmp.ne.s32.totalorder %v5475_v48, 7  ;;  %v611_v18 = vrot.slane %v4476_v56, 1  ;;  %v3928_v48 = vld [vmem:[#allocation7 + $0x34] ss:$12 sps:$4 sm:$0xff]  }
  0x87   :  { %1273 = vmatprep.subr.bf16.mxu0 %v3910_v12  ;;  %v629_v12 = vsel %vm5415_vm10, %v600_v29, %v601_v21  ;;  %v5483_v56 = vand.u32 7, %v4386_v62  ;;  %v614_v62 = vrot.slane %v4246_v43, 1 }
  0x88   :  { %3117 = vmatmul.mubr.msk.bf16.gmra.mrb[8].mxu0 %vm4345_vm9, %v4343_v28  ;;  %3217 = vmatmul.mubr.msk.bf16.gmra.mrb[24].mxu1 %vm4508_vm8, %v4545_v9  ;;  %v3916_v28 = vld [vmem:[#allocation5 + $0x214] ss:$12 sps:$4 sm:$0xff]   ;;  %vm3517_vm7 = vcmp.ne.s32.totalorder %v5472_v61, 7  ;;  %v3923_v61 = vld [vmem:[#allocation7 + $0x18] ss:$12 sps:$4 sm:$0xff]  }
  0x89   :  { %1214 = vmatprep.mubr.bf16.mxu0 %v4353_v38  ;;  %1466 = vmatprep.mubr.bf16.mxu1 %v4550_v7  ;;  %v630_v38 = vsel %vm5415_vm10, %v599_v30, %v600_v29 }
  0x8a   :  { %1274 = vmatpush1.bf16.msra.mxu0 %v3908_v24  ;;  %v603_v24 = vrot.slane %v4298_v2, 1  ;;  %v4606_v49 = vpack.c.bf16 %v629_v12, %v630_v38  ;;  %v628_v2 = vsel %vm5415_vm10, %v601_v21, %v602_v31  ;;  %v610_v38 = vrot.slane %v4432_v55, 1 }
  0x8b   :  { %1275 = vmatprep.subr.bf16.mxu0 %v3913_v60  ;;  %v5482_v55 = vand.u32 7, %v4389_v63 }
  0x8c   :  { %v627_v3 = vsel %vm5415_vm10, %v602_v31, %v603_v24 }
  0x8d   :  { %v3151_v21 = vpack.c.bf16 %v627_v3, %v628_v2 }
  0x8e   :  { %1276 = vmatpush1.bf16.msra.mxu0 %v3911_v22  ;;  %v607_v22 = vrot.slane %v4381_v57, 1 }
  0x8f   :  { %1277 = vmatprep.subr.bf16.mxu0 %v3916_v28 }
  0x90   :  { %3122 = vmatmul.mubr.msk.bf16.gmra.mrb[12].mxu0 %vm4399_vm12, %v4393_v8  ;;  %3222 = vmatmul.mubr.msk.bf16.gmra.mrb[28].mxu1 %vm4554_vm1, %v4602_v36  ;;  %v626_v8 = vsel %vm5415_vm10, %v603_v24, %v604_v1 }
  0x91   :  { %1224 = vmatprep.mubr.bf16.mxu0 %v4407_v20  ;;  %3703 = vmatprep.mubr.msk.bf16.mxu1 %vm4562_vm5, %v4606_v49  ;;  %v606_v20 = vrot.slane %v4339_v25, 1  ;;  %v3156_v28 = vpack.c.bf16 %v625_v23, %v626_v8 }
  0x92   :  { %1278 = vmatpush1.bf16.msra.mxu0 %v3914_v6  ;;  %v613_v6 = vrot.slane %v4516_v34, 1  ;;  %v5486_v34 = vand.u32 7, %v4443_v37  ;;  %v5494_v37 = vand.u32 7, %v4471_v26 }
  0x93   :  { %1279 = vmatprep.subr.bf16.mxu0 %v3919_v45  ;;  %v623_v25 = vsel %vm5415_vm10, %v606_v20, %v607_v22  ;;  %v624_v57 = vsel %vm5415_vm10, %v605_v4, %v606_v20  ;;  %v5487_v45 = vand.u32 7, %v4428_v50  ;;  %v4137_v4 = vmov 0  }
  0x94   :  { %v3161_v12 = vpack.c.bf16 %v623_v25, %v624_v57  ;;  %vm3523_vm9 = vcmp.ne.s32.totalorder %v5486_v34, 7  ;;  %v3925_v57 = vld [vmem:[#allocation7 + $0x1c] ss:$12 sps:$4 sm:$0xff]  }
  0x95   :  { %v3937_v34 = vld [vmem:[#allocation7 + $0x7c] ss:$12 sps:$4 sm:$0xff]  }
  0x96   :  { %1280 = vmatpush1.bf16.msra.mxu0 %v3917_v51 }
  0x98   :  { %3127 = vmatmul.mubr.msk.bf16.gmra.mrb[16].mxu0 %vm4447_vm2, %v4451_v15  ;;  %3704 = vmatmul.mubr.msk.bf16.vlgmr.msra.gmra.mrb[32].mxu1 %vm4612_vm15, %v3151_v21  ;;  %v621_v15 = vsel %vm5415_vm10, %v608_v53, %v609_v47  ;;  %vm4670_vm2 = vmpackc.low %vm3517_vm7, %vm3518_vm11  ;;  %vm5480_vm7 = vcmp.lt.s32.totalorder %v4224_v17, 7 }
  0x99   :  { %1234 = vmatprep.mubr.bf16.mxu0 %v4457_v0  ;;  %3707 = vmatprep.mubr.msk.bf16.mxu1 %vm4618_vm0, %v3156_v28  ;;  %v622_v0 = vsel %vm5415_vm10, %v607_v22, %v608_v53  ;;  %vm4676_vm10 = vmpackc.low %vm3519_vm13, %vm3520_vm14  ;;  %v619_v27 = vsel %vm5480_vm7, %v610_v38, %v611_v18  ;;  %vm3521_vm13 = vcmp.ne.s32.totalorder %v5482_v55, 7  ;;  %vm3522_vm14 = vcmp.ne.s32.totalorder %v5483_v56, 7  ;;  %v3922_v53 = vld [vmem:[#allocation7 + $0x4] ss:$12 sps:$4 sm:$0xff]  }
  0x9a   :  { %v3166_v39 = vpack.c.bf16 %v621_v15, %v622_v0  ;;  %vm5481_vm11 = vmmov %vm5480_vm7  ;;  %2367 = vmatprep.subr.bf16.mxu1 %v3922_v53  ;;  %v3934_v55 = vld [vmem:[#allocation7 + $0x64] ss:$12 sps:$4 sm:$0xff]   ;;  %v3946_v53 = vld [vmem:[#allocation7 + $0xc0] ss:$12 sps:$4 sm:$0xff]  }
  0x9b   :  { %v620_v42 = vsel %vm5481_vm11, %v609_v47, %v610_v38  ;;  %vm4704_vm11 = vmpackc.low %vm3521_vm13, %vm3522_vm14  ;;  %vm3526_vm13 = vcmp.ne.s32.totalorder %v5494_v37, 7  ;;  %v3926_v38 = vld [vmem:[#allocation7 + $0x30] ss:$12 sps:$4 sm:$0xff]  }
  0x9c   :  { %v3171_v31 = vpack.c.bf16 %v619_v27, %v620_v42 }
  0xa0   :  { %3132 = vmatmul.mubr.msk.bf16.gmra.mrb[20].mxu0 %vm4461_vm4, %v4498_v59  ;;  %3708 = vmatmul.mubr.msk.bf16.gmra.mrb[36].mxu1 %vm4670_vm2, %v3161_v12  ;;  %vm5484_vm4 = vmmov %vm5480_vm7  ;;  %vm3524_vm7 = vcmp.ne.s32.totalorder %v5487_v45, 7  ;;  %v3935_v45 = vld [vmem:[#allocation7 + $0x78] ss:$12 sps:$4 sm:$0xff]  }
  0xa1   :  { %1244 = vmatprep.mubr.bf16.mxu0 %v4504_v41  ;;  %3711 = vmatprep.mubr.msk.bf16.mxu1 %vm4676_vm10, %v3166_v39  ;;  %v617_v59 = vsel %vm5484_vm4, %v612_v11, %v613_v6  ;;  %vm5485_vm12 = vmmov %vm5484_vm4 }
  0xa2   :  { %v618_v41 = vsel %vm5485_vm12, %v611_v18, %v612_v11  ;;  %vm4709_vm6 = vmpackc.low %vm3523_vm9, %vm3524_vm7  ;;  %v3929_v11 = vld [vmem:[#allocation7 + $0x48] ss:$12 sps:$4 sm:$0xff]   ;;  %vm5497_vm7 = vcmp.lt.s32.totalorder %v4224_v17, 1 }
  0xa3   :  { %v3176_v63 = vpack.c.bf16 %v617_v59, %v618_v41  ;;  %vm5492_vm12 = vmmov %vm5484_vm4  ;;  %v3932_v59 = vld [vmem:[#allocation7 + $0x60] ss:$12 sps:$4 sm:$0xff]  }
  0xa4   :  { %v616_v50 = vsel %vm5492_vm12, %v613_v6, %v614_v62  ;;  %vm5493_vm9 = vmmov %vm5484_vm4  ;;  %vm3525_vm4 = vcmp.ne.s32.totalorder %v211_v46, 7 }
  0xa5   :  { %v631_v43 = vsel %vm5493_vm9, %v614_v62, %v599_v30  ;;  %vm4731_vm14 = vmpackc.low %vm3525_vm4, %vm3526_vm13  ;;  %vm5501_vm13 = vcmp.lt.s32.totalorder %v4224_v17, 7 }
  0xa6   :  { %vm5498_vm12 = vmmov %vm5497_vm7 }
  0xa7   :  { %vm5499_vm9 = vmmov %vm5497_vm7 }
  0xa8   :  { %3137 = vmatmul.mubr.msk.bf16.gmra.mrb[24].mxu0 %vm4508_vm8, %v4545_v9  ;;  %3712 = vmatmul.mubr.msk.bf16.gmra.mrb[40].mxu1 %vm4704_vm11, %v3171_v31  ;;  %vm5500_vm4 = vmmov %vm5497_vm7 }
  0xa9   :  { %1254 = vmatprep.mubr.bf16.mxu0 %v4550_v7  ;;  %3715 = vmatprep.mubr.msk.bf16.mxu1 %vm4709_vm6, %v3176_v63  ;;  %v3181_v7 = vpack.c.bf16 %v631_v43, %v616_v50  ;;  %v3940_v43 = vld [vmem:[#allocation7 + $0x94] ss:$12 sps:$4 sm:$0xff]  }
  0xb0   :  { %3142 = vmatmul.mubr.msk.bf16.gmra.mrb[28].mxu0 %vm4554_vm1, %v4602_v36  ;;  %3716 = vmatmul.mubr.msk.bf16.gmra.mrb[44].mxu1 %vm4731_vm14, %v3181_v7 }
  0xb1   :  { %1297 = vmatprep.mubr.bf16.mxu0 %v4137_v4 }
  0xb8   :  { %3147 = vmatmul.mubr.msk.bf16.vlgmr.msra.gmra.mrb[0].mxu0 %vm4562_vm5, %v4606_v49 }
  0xb9   :  { %1307 = vmatprep.mubr.bf16.mxu0 %v4137_v4 }
  0xc0   :  { %3152 = vmatmul.mubr.msk.bf16.gmra.mrb[4].mxu0 %vm4612_vm15, %v3151_v21 }
  0xc1   :  { %1317 = vmatprep.mubr.bf16.mxu0 %v4137_v4 }
  0xc8   :  { %3157 = vmatmul.mubr.msk.bf16.gmra.mrb[8].mxu0 %vm4618_vm0, %v3156_v28  ;;  %v3920_v28 = vld [vmem:[#allocation7] ss:$12 sps:$4 sm:$0xff]  }
  0xc9   :  { %1327 = vmatprep.mubr.bf16.mxu0 %v4137_v4  ;;  %2368 = vmatpush1.bf16.msra.mxu1 %v3920_v28  ;;  %v3949_v28 = vld [vmem:[#allocation7 + $0xe0] ss:$12 sps:$4 sm:$0xff]  }
  0xca   :  { %2369 = vmatprep.subr.bf16.mxu1 %v3925_v57  ;;  %v3953_v57 = vld [vmem:[#allocation7 + $0xdc] ss:$12 sps:$4 sm:$0xff]  }
  0xcd   :  { %2370 = vmatpush1.bf16.msra.mxu1 %v3923_v61  ;;  %v3950_v61 = vld [vmem:[#allocation7 + $0x20] ss:$12 sps:$4 sm:$0xff]  }
  0xce   :  { %2371 = vmatprep.subr.bf16.mxu1 %v3928_v48 }
  0xd0   :  { %3162 = vmatmul.mubr.msk.bf16.gmra.mrb[12].mxu0 %vm4670_vm2, %v3161_v12 }
  0xd1   :  { %1337 = vmatprep.mubr.bf16.mxu0 %v4137_v4  ;;  %2372 = vmatpush1.bf16.msra.mxu1 %v3926_v38  ;;  %v3956_v38 = vld [vmem:[#allocation7 + $0xf4] ss:$12 sps:$4 sm:$0xff]  }
  0xd8   :  { %3167 = vmatmul.mubr.msk.bf16.gmra.mrb[16].mxu0 %vm4676_vm10, %v3166_v39  ;;  %v3931_v39 = vld [vmem:[#allocation7 + $0x4c] ss:$12 sps:$4 sm:$0xff]  }
  0xd9   :  { %1347 = vmatprep.mubr.bf16.mxu0 %v4137_v4  ;;  %2373 = vmatprep.subr.bf16.mxu1 %v3931_v39  ;;  %v3957_v39 = vld [vmem:[#allocation7 + $0xf8] ss:$12 sps:$4 sm:$0xff]  }
  0xda   :  { %2374 = vmatpush1.bf16.msra.mxu1 %v3929_v11 }
  0xdb   :  { %2375 = vmatprep.subr.bf16.mxu1 %v3934_v55  ;;  %v3961_v55 = vld [vmem:[#allocation7 + $0x10c] ss:$12 sps:$4 sm:$0xff]  }
  0xde   :  { %2376 = vmatpush1.bf16.msra.mxu1 %v3932_v59  ;;  %v3959_v59 = vld [vmem:[#allocation7 + $0x108] ss:$12 sps:$4 sm:$0xff]  }
  0xdf   :  { %2377 = vmatprep.subr.bf16.mxu1 %v3937_v34  ;;  %v3963_v34 = vld [vmem:[#allocation7 + $0x50] ss:$12 sps:$4 sm:$0xff]  }
  0xe0   :  { %3172 = vmatmul.mubr.msk.bf16.gmra.mrb[20].mxu0 %vm4704_vm11, %v3171_v31 }
  0xe1   :  { %1357 = vmatprep.mubr.bf16.mxu0 %v4137_v4 }
  0xe2   :  { %2378 = vmatpush1.bf16.msra.mxu1 %v3935_v45 }
  0xe3   :  { %2379 = vmatprep.subr.bf16.mxu1 %v3940_v43  ;;  %v3966_v43 = vld [vmem:[#allocation7 + $0x124] ss:$12 sps:$4 sm:$0xff]  }
  0xe8   :  { %3177 = vmatmul.mubr.msk.bf16.gmra.mrb[24].mxu0 %vm4709_vm6, %v3176_v63 }
  0xe9   :  { %1367 = vmatprep.mubr.bf16.mxu0 %v4137_v4 }
  0xf0   :  { %3182 = vmatmul.mubr.msk.bf16.gmra.mrb[28].mxu0 %vm4731_vm14, %v3181_v7  ;;  %v3938_v7 = vld [vmem:[#allocation7 + $0x90] ss:$12 sps:$4 sm:$0xff]  }
  0xf1   :  { %2380 = vmatpush1.bf16.msra.mxu1 %v3938_v7 }
 0x12b   :  { %v3543_v35 = vpop.f32.mrb[0].mxu1 }
 0x12c   :  { %v3544_v26 = vpop.f32.mrb[1].mxu1 }
 0x12d   :  { %v3546_v58 = vpop.f32.mrb[2].mxu1  ;;  %v3945_v26 = vld [vmem:[#allocation7 + $0xac] ss:$12 sps:$4 sm:$0xff]  }
 0x12e   :  { %v3547_v46 = vpop.f32.mrb[3].mxu1  ;;  %2381 = vmatprep.subr.bf16.mxu1 %v3945_v26 }
 0x12f   :  { %v4765_v30 = vadd.f32 %v3547_v46, %v3546_v58  ;;  %v3943_v58 = vld [vmem:[#allocation7 + $0xa8] ss:$12 sps:$4 sm:$0xff]  }
 0x130   :  { %2382 = vmatpush1.bf16.msra.mxu1 %v3943_v58  ;;  %v3964_v58 = vld [vmem:[#allocation7 + $0x120] ss:$12 sps:$4 sm:$0xff]  }
 0x133   :  { %v3549_v36 = vpop.f32.mrb[4].mxu1 }
 0x134   :  { %v3550_v49 = vpop.f32.mrb[5].mxu1 }
 0x135   :  { %v4767_v51 = vadd.f32 %v3550_v49, %v3549_v36  ;;  %v3552_v2 = vpop.f32.mrb[6].mxu1 }
 0x136   :  { %v3553_v3 = vpop.f32.mrb[7].mxu1 }
 0x137   :  { %v4769_v23 = vadd.f32 %v3553_v3, %v3552_v2  ;;  %v3941_v3 = vld [vmem:[#allocation7 + $0xc8] ss:$12 sps:$4 sm:$0xff]  }
 0x138   :  { %3607 = vmatprep.subr.bf16.mxu0 %v3941_v3  ;;  %v3969_v3 = vld [vmem:[#allocation7 + $0x138] ss:$12 sps:$4 sm:$0xff]  }
 0x13b   :  { %v3555_v8 = vpop.f32.mrb[8].mxu1 }
 0x13c   :  { %v3556_v20 = vpop.f32.mrb[9].mxu1 }
 0x13d   :  { %v4771_v22 = vadd.f32 %v3556_v20, %v3555_v8  ;;  %v3558_v21 = vpop.f32.mrb[10].mxu1  ;;  %v3948_v8 = vld [vmem:[#allocation7 + $0xc4] ss:$12 sps:$4 sm:$0xff]  }
 0x13e   :  { %v3559_v47 = vpop.f32.mrb[11].mxu1  ;;  %2383 = vmatprep.subr.bf16.mxu1 %v3948_v8  ;;  %v3973_v8 = vld [vmem:[#allocation7 + $0x80] ss:$12 sps:$4 sm:$0xff]  }
 0x13f   :  { %v4773_v25 = vadd.f32 %v3559_v47, %v3558_v21  ;;  %v3942_v21 = vld [vmem:[#allocation7 + $0x8] ss:$12 sps:$4 sm:$0xff]   ;;  %2384 = vmatpush1.bf16.msra.mxu1 %v3946_v53 }
 0x140   :  { %3608 = vmatpush3.bf16.msra.mxu0 %v3942_v21  ;;  %2385 = vmatprep.subr.bf16.mxu1 %v3953_v57  ;;  %v3977_v57 = vld [vmem:[#allocation7 + $0x158] ss:$12 sps:$4 sm:$0xff]  }
 0x141   :  { %3609 = vmatprep.subr.bf16.mxu0 %v3949_v28  ;;  %v3976_v28 = vld [vmem:[#allocation7 + $0x154] ss:$12 sps:$4 sm:$0xff]  }
 0x143   :  { %v3561_v54 = vpop.f32.mrb[12].mxu1 }
 0x144   :  { %v3562_v15 = vpop.f32.mrb[13].mxu1  ;;  %3610 = vmatpush3.bf16.msra.mxu0 %v3950_v61 }
 0x145   :  { %v4775_v0 = vadd.f32 %v3562_v15, %v3561_v54  ;;  %v3564_v5 = vpop.f32.mrb[14].mxu1  ;;  %v3951_v54 = vld [vmem:[#allocation7 + $0xd8] ss:$12 sps:$4 sm:$0xff]   ;;  %3611 = vmatprep.subr.bf16.mxu0 %v3957_v39  ;;  %v3982_v39 = vld [vmem:[#allocation7 + $0x170] ss:$12 sps:$4 sm:$0xff]  }
 0x146   :  { %v3565_v12 = vpop.f32.mrb[15].mxu1  ;;  %2386 = vmatpush1.bf16.msra.mxu1 %v3951_v54 }
 0x147   :  { %v4777_v18 = vadd.f32 %v3565_v12, %v3564_v5  ;;  %2387 = vmatprep.subr.bf16.mxu1 %v3956_v38  ;;  %v3981_v38 = vld [vmem:[#allocation7 + $0x16c] ss:$12 sps:$4 sm:$0xff]  }
 0x14b   :  { %v3567_v6 = vpop.f32.mrb[16].mxu1 }
 0x14c   :  { %v3568_v27 = vpop.f32.mrb[17].mxu1  ;;  %v3954_v6 = vld [vmem:[#allocation7 + $0xf0] ss:$12 sps:$4 sm:$0xff]  }
 0x14d   :  { %v3570_v42 = vpop.f32.mrb[18].mxu1  ;;  %v3958_v27 = vld [vmem:[#allocation7 + $0x38] ss:$12 sps:$4 sm:$0xff]   ;;  %2388 = vmatpush1.bf16.msra.mxu1 %v3954_v6 }
 0x14e   :  { %v3571_v56 = vpop.f32.mrb[19].mxu1  ;;  %3612 = vmatpush3.bf16.msra.mxu0 %v3958_v27  ;;  %2389 = vmatprep.subr.bf16.mxu1 %v3961_v55 }
 0x14f   :  { %v4779_v41 = vadd.f32 %v3571_v56, %v3570_v42  ;;  %v3962_v56 = vld [vmem:[#allocation7 + $0x110] ss:$12 sps:$4 sm:$0xff]  }
 0x150   :  { %3613 = vmatprep.subr.bf16.mxu0 %v3962_v56  ;;  %v3986_v56 = vld [vmem:[#allocation7 + $0x184] ss:$12 sps:$4 sm:$0xff]  }
 0x151   :  { %2390 = vmatpush1.bf16.msra.mxu1 %v3959_v59 }
 0x152   :  { %3614 = vmatpush3.bf16.msra.mxu0 %v3963_v34  ;;  %2391 = vmatprep.subr.bf16.mxu1 %v3966_v43 }
 0x153   :  { %v3573_v31 = vpop.f32.mrb[20].mxu1 }
 0x154   :  { %v3574_v63 = vpop.f32.mrb[21].mxu1 }
 0x155   :  { %v4781_v62 = vadd.f32 %v3574_v63, %v3573_v31  ;;  %v3576_v50 = vpop.f32.mrb[22].mxu1  ;;  %2392 = vmatpush1.bf16.msra.mxu1 %v3964_v58 }
 0x156   :  { %v3577_v37 = vpop.f32.mrb[23].mxu1 }
 0x157   :  { %v4783_v35 = vadd.f32 %v3577_v37, %v3576_v50  ;;  %v3967_v37 = vld [vmem:[#allocation7 + $0x128] ss:$12 sps:$4 sm:$0xff]  }
 0x158   :  { %3615 = vmatprep.subr.bf16.mxu0 %v3967_v37 }
 0x15b   :  { %v3579_v46 = vpop.f32.mrb[24].mxu1 }
 0x15c   :  { %v3580_v36 = vpop.f32.mrb[25].mxu1 }
 0x15d   :  { %v4785_v49 = vadd.f32 %v3580_v36, %v3579_v46  ;;  %v3582_v2 = vpop.f32.mrb[26].mxu1  ;;  %v3968_v46 = vld [vmem:[#allocation7 + $0x68] ss:$12 sps:$4 sm:$0xff]  }
 0x15e   :  { %v3583_v20 = vpop.f32.mrb[27].mxu1  ;;  %3616 = vmatpush3.bf16.msra.mxu0 %v3968_v46 }
 0x15f   :  { %v4787_v47 = vadd.f32 %v3583_v20, %v3582_v2  ;;  %v3972_v2 = vld [vmem:[#allocation7 + $0x140] ss:$12 sps:$4 sm:$0xff]  }
 0x160   :  { %3617 = vmatprep.subr.bf16.mxu0 %v3972_v2 }
 0x162   :  { %3618 = vmatpush3.bf16.msra.mxu0 %v3973_v8 }
 0x163   :  { %v3585_v15 = vpop.f32.mrb[28].mxu1  ;;  %3619 = vmatprep.subr.bf16.mxu0 %v3977_v57 }
 0x164   :  { %v3586_v5 = vpop.f32.mrb[29].mxu1 }
 0x165   :  { %v4789_v48 = vadd.f32 %v3586_v5, %v3585_v15  ;;  %v3588_v12 = vpop.f32.mrb[30].mxu1  ;;  %v3974_v15 = vld [vmem:[#allocation7 + $0x150] ss:$12 sps:$4 sm:$0xff]   ;;  %v3978_v5 = vld [vmem:[#allocation7 + $0x98] ss:$12 sps:$4 sm:$0xff]  }
 0x166   :  { %v3589_v11 = vpop.f32.mrb[31].mxu1  ;;  %3620 = vmatpush3.bf16.msra.mxu0 %v3978_v5 }
 0x167   :  { %v4791_v42 = vadd.f32 %v3589_v11, %v3588_v12  ;;  %v3983_v11 = vld [vmem:[#allocation7 + $0xb0] ss:$12 sps:$4 sm:$0xff]   ;;  %3621 = vmatprep.subr.bf16.mxu0 %v3982_v39 }
 0x16a   :  { %3622 = vmatpush3.bf16.msra.mxu0 %v3983_v11 }
 0x16b   :  { %v3705_v45 = vpop.f32.mrb[32].mxu1 }
 0x16c   :  { %v4794_v31 = vadd.f32 %v3705_v45, %v4767_v51  ;;  %v1509_v63 = vpop.f32.mrb[33].mxu1  ;;  %v3971_v51 = vld [vmem:[#allocation7 + $0x13c] ss:$12 sps:$4 sm:$0xff]  }
 0x16d   :  { %v3706_v50 = vpop.f32.mrb[34].mxu1  ;;  %2393 = vmatprep.subr.bf16.mxu1 %v3971_v51 }
 0x16e   :  { %v4797_v7 = vadd.f32 %v3706_v50, %v4769_v23  ;;  %v1512_v26 = vpop.f32.mrb[35].mxu1  ;;  %2394 = vmatpush1.bf16.msra.mxu1 %v3969_v3 }
 0x16f   :  { %v1513_v36 = vadd.f32 %v4765_v30, %v1512_v26  ;;  %2395 = vmatprep.subr.bf16.mxu1 %v3976_v28 }
 0x172   :  { %2396 = vmatpush1.bf16.msra.mxu1 %v3974_v15 }
 0x173   :  { %v3709_v20 = vpop.f32.mrb[36].mxu1  ;;  %2397 = vmatprep.subr.bf16.mxu1 %v3981_v38 }
 0x174   :  { %v4801_v21 = vadd.f32 %v3709_v20, %v4775_v0  ;;  %v1525_v23 = vpop.f32.mrb[37].mxu1  ;;  %v3979_v0 = vld [vmem:[#allocation7 + $0x168] ss:$12 sps:$4 sm:$0xff]  }
 0x175   :  { %v1526_v53 = vadd.f32 %v4771_v22, %v1525_v23  ;;  %v3710_v30 = vpop.f32.mrb[38].mxu1 }
 0x176   :  { %v4805_v61 = vadd.f32 %v3710_v30, %v4777_v18  ;;  %v1528_v54 = vpop.f32.mrb[39].mxu1  ;;  %2398 = vmatpush1.bf16.msra.mxu1 %v3979_v0  ;;  %v4835_v30 = vld [vmem:[#allocation7 + $0x188] ss:$12 sps:$4 sm:$0xff]  }
 0x177   :  { %v1529_v12 = vadd.f32 %v4773_v25, %v1528_v54  ;;  %2480 = vmatprep.subr.bf16.mxu1 %v3986_v56  ;;  %3719 = vmatprep.subr.bf16.mxu0 %v4835_v30 }
 0x17b   :  { %v3713_v22 = vpop.f32.mrb[40].mxu1 }
 0x17c   :  { %v4809_v6 = vadd.f32 %v3713_v22, %v4781_v62  ;;  %v1541_v18 = vpop.f32.mrb[41].mxu1 }
 0x17d   :  { %v3714_v27 = vpop.f32.mrb[42].mxu1 }
 0x17e   :  { %v4812_v25 = vadd.f32 %v3714_v27, %v4783_v35  ;;  %v1544_v55 = vpop.f32.mrb[43].mxu1 }
 0x17f   :  { %v1545_v59 = vadd.f32 %v4779_v41, %v1544_v55 }
 0x183   :  { %v3717_v34 = vpop.f32.mrb[44].mxu1 }
 0x184   :  { %v4816_v45 = vadd.f32 %v3717_v34, %v4789_v48  ;;  %v1557_v63 = vpop.f32.mrb[45].mxu1 }
 0x185   :  { %v4819_v62 = vadd.f32 %v4785_v49, %v1557_v63  ;;  %v3718_v50 = vpop.f32.mrb[46].mxu1 }
 0x186   :  { %v4822_v43 = vadd.f32 %v3718_v50, %v4791_v42  ;;  %v1560_v37 = vpop.f32.mrb[47].mxu1 }
 0x187   :  { %v4825_v35 = vadd.f32 %v4787_v47, %v1560_v37 }
 0x18b   :  { %v1299_v26 = vpop.f32.mrb[0].mxu0 }
 0x18c   :  { %v1301_v58 = vpop.f32.mrb[1].mxu0 }
 0x18d   :  { %v4827_v41 = vadd.f32 %v1513_v36, %v1301_v58  ;;  %v1303_v46 = vpop.f32.mrb[2].mxu0 }
 0x18e   :  { %v1305_v51 = vpop.f32.mrb[3].mxu0 }
 0x18f   :  { %v1605_v48 = vadd.f32 %v1305_v51, %v1299_v26 }
 0x191   :  { %v4830_v2 = vadd.f32 %v1605_v48, %v4794_v31 }
 0x193   :  { %v1309_v49 = vpop.f32.mrb[4].mxu0  ;;  %v1662_v5 = vmul.f32 %v4830_v2, %v4830_v2 }
 0x194   :  { %v1311_v3 = vpop.f32.mrb[5].mxu0 }
 0x195   :  { %v1606_v8 = vadd.f32 %v1311_v3, %v1303_v46  ;;  %v1313_v20 = vpop.f32.mrb[6].mxu0 }
 0x196   :  { %v1315_v42 = vpop.f32.mrb[7].mxu0 }
 0x197   :  { %v4833_v23 = vadd.f32 %v1606_v8, %v4797_v7  ;;  %v1607_v47 = vadd.f32 %v1315_v42, %v1309_v49  ;;  %v1661_v7 = vmul.f32 %v4827_v41, %v4827_v41 }
 0x199   :  { %v4837_v28 = vadd.f32 %v1607_v47, %v1526_v53  ;;  %v1638_v53 = vadd.f32 %v4830_v2, %v4827_v41  ;;  %v1663_v39 = vmul.f32 %v4833_v23, %v4833_v23  ;;  %v1677_v22 = vadd.f32 %v1662_v5, %v1661_v7 }
 0x19b   :  { %v1319_v36 = vpop.f32.mrb[8].mxu0  ;;  %v1639_v18 = vadd.f32 %v1638_v53, %v4833_v23  ;;  %v1664_v56 = vmul.f32 %v4837_v28, %v4837_v28 }
 0x19c   :  { %v1321_v57 = vpop.f32.mrb[9].mxu0 }
 0x19d   :  { %v1608_v54 = vadd.f32 %v1321_v57, %v1313_v20  ;;  %v1323_v31 = vpop.f32.mrb[10].mxu0  ;;  %v1640_v37 = vadd.f32 %v1639_v18, %v4837_v28 }
 0x19e   :  { %v1325_v15 = vpop.f32.mrb[11].mxu0 }
 0x19f   :  { %v4842_v0 = vadd.f32 %v1608_v54, %v1529_v12  ;;  %v1609_v38 = vadd.f32 %v1325_v15, %v1319_v36  ;;  %v1678_v12 = vadd.f32 %v1677_v22, %v1663_v39 }
 0x1a1   :  { %v4851_v11 = vadd.f32 %v1609_v38, %v4801_v21  ;;  %v1665_v26 = vmul.f32 %v4842_v0, %v4842_v0  ;;  %v1679_v46 = vadd.f32 %v1678_v12, %v1664_v56  ;;  %v1641_v51 = vadd.f32 %v1640_v37, %v4842_v0 }
 0x1a3   :  { %v1329_v27 = vpop.f32.mrb[12].mxu0  ;;  %v1680_v48 = vadd.f32 %v1679_v46, %v1665_v26  ;;  %v1666_v49 = vmul.f32 %v4851_v11, %v4851_v11  ;;  %v1642_v20 = vadd.f32 %v1641_v51, %v4851_v11 }
 0x1a4   :  { %v1331_v55 = vpop.f32.mrb[13].mxu0 }
 0x1a5   :  { %v1610_v34 = vadd.f32 %v1331_v55, %v1323_v31  ;;  %v1333_v63 = vpop.f32.mrb[14].mxu0  ;;  %v1681_v57 = vadd.f32 %v1680_v48, %v1666_v49 }
 0x1a6   :  { %v1335_v50 = vpop.f32.mrb[15].mxu0 }
 0x1a7   :  { %v4860_v21 = vadd.f32 %v1610_v34, %v4805_v61  ;;  %v4862_v58 = vadd.f32 %v1335_v50, %v1329_v27 }
 0x1a9   :  { %v1667_v42 = vmul.f32 %v4860_v21, %v4860_v21  ;;  %v1643_v54 = vadd.f32 %v1642_v20, %v4860_v21  ;;  %v1668_v7 = vmul.f32 %v4862_v58, %v4862_v58 }
 0x1ab   :  { %v1339_v3 = vpop.f32.mrb[16].mxu0  ;;  %v1682_v15 = vadd.f32 %v1681_v57, %v1667_v42  ;;  %v1644_v38 = vadd.f32 %v1643_v54, %v4862_v58 }
 0x1ac   :  { %v1341_v8 = vpop.f32.mrb[17].mxu0 }
 0x1ad   :  { %v4870_v47 = vadd.f32 %v1545_v59, %v1341_v8  ;;  %v1343_v61 = vpop.f32.mrb[18].mxu0  ;;  %v1683_v22 = vadd.f32 %v1682_v15, %v1668_v7 }
 0x1ae   :  { %v1345_v36 = vpop.f32.mrb[19].mxu0 }
 0x1af   :  { %v1613_v31 = vadd.f32 %v1345_v36, %v1339_v3  ;;  %v1669_v53 = vmul.f32 %v4870_v47, %v4870_v47  ;;  %v1645_v18 = vadd.f32 %v1644_v38, %v4870_v47 }
 0x1b1   :  { %v4874_v5 = vadd.f32 %v1613_v31, %v4809_v6  ;;  %v1684_v56 = vadd.f32 %v1683_v22, %v1669_v53 }
 0x1b3   :  { %v1349_v59 = vpop.f32.mrb[20].mxu0  ;;  %v1670_v27 = vmul.f32 %v4874_v5, %v4874_v5  ;;  %v1646_v34 = vadd.f32 %v1645_v18, %v4874_v5 }
 0x1b4   :  { %v1351_v39 = vpop.f32.mrb[21].mxu0 }
 0x1b5   :  { %v1614_v55 = vadd.f32 %v1351_v39, %v1343_v61  ;;  %v1353_v12 = vpop.f32.mrb[22].mxu0  ;;  %v1685_v37 = vadd.f32 %v1684_v56, %v1670_v27 }
 0x1b6   :  { %v1355_v6 = vpop.f32.mrb[23].mxu0 }
 0x1b7   :  { %v4886_v63 = vadd.f32 %v1614_v55, %v4812_v25  ;;  %v1615_v50 = vadd.f32 %v1355_v6, %v1349_v59 }
 0x1b9   :  { %v1647_v26 = vadd.f32 %v1646_v34, %v4886_v63  ;;  %v1671_v46 = vmul.f32 %v4886_v63, %v4886_v63  ;;  %v4892_v51 = vadd.f32 %v1615_v50, %v4819_v62 }
 0x1bb   :  { %v1686_v48 = vadd.f32 %v1685_v37, %v1671_v46  ;;  %v1648_v49 = vadd.f32 %v1647_v26, %v4892_v51  ;;  %v1672_v3 = vmul.f32 %v4892_v51, %v4892_v51  ;;  %v1359_v8 = vpop.f32.mrb[24].mxu0 }
 0x1bc   :  { %v1361_v20 = vpop.f32.mrb[25].mxu0 }
 0x1bd   :  { %v1687_v25 = vadd.f32 %v1686_v48, %v1672_v3  ;;  %v1616_v42 = vadd.f32 %v1361_v20, %v1353_v12  ;;  %v1363_v61 = vpop.f32.mrb[26].mxu0 }
 0x1be   :  { %v1365_v36 = vpop.f32.mrb[27].mxu0 }
 0x1bf   :  { %v4898_v57 = vadd.f32 %v1616_v42, %v4825_v35  ;;  %v1617_v54 = vadd.f32 %v1365_v36, %v1359_v8 }
 0x1c1   :  { %v1649_v31 = vadd.f32 %v1648_v49, %v4898_v57  ;;  %v1673_v62 = vmul.f32 %v4898_v57, %v4898_v57  ;;  %v4904_v15 = vadd.f32 %v1617_v54, %v4816_v45 }
 0x1c3   :  { %v1688_v38 = vadd.f32 %v1687_v25, %v1673_v62  ;;  %v1650_v7 = vadd.f32 %v1649_v31, %v4904_v15  ;;  %v1674_v53 = vmul.f32 %v4904_v15, %v4904_v15  ;;  %v1369_v59 = vpop.f32.mrb[28].mxu0 }
 0x1c4   :  { %v1371_v39 = vpop.f32.mrb[29].mxu0 }
 0x1c5   :  { %v1689_v22 = vadd.f32 %v1688_v38, %v1674_v53  ;;  %v1618_v35 = vadd.f32 %v1371_v39, %v1363_v61  ;;  %v1373_v18 = vpop.f32.mrb[30].mxu0  ;;  %v4919_v39 = vsub.s32 0, %v4224_v17 }
 0x1c6   :  { %v1375_v27 = vpop.f32.mrb[31].mxu0  ;;  %v1637_v18 = vld [vmem:[%s5391_s3] sm:$0x1] }
 0x1c7   :  { %v4910_v55 = vadd.f32 %v1618_v35, %v4822_v43  ;;  %v1619_v12 = vadd.f32 %v1375_v27, %v1369_v59  ;;  %v1636_v59 = vld [vmem:[%s5390_s2] sm:$0x1] }
 0x1c9   :  { %v1675_v45 = vmul.f32 %v4910_v55, %v4910_v55  ;;  %v1651_v6 = vadd.f32 %v1650_v7, %v4910_v55  ;;  %v1676_v34 = vmul.f32 %v1619_v12, %v1619_v12 }
 0x1cb   :  { %v1652_v56 = vadd.f32 %v1651_v6, %v1619_v12  ;;  %v1690_v50 = vadd.f32 %v1689_v22, %v1675_v45 }
 0x1cd   :  { %v1653_v37 = vrot.slane %v1652_v56, 4  ;;  %v1691_v26 = vadd.f32 %v1690_v50, %v1676_v34 }
 0x1cf   :  { %v1654_v46 = vadd.f32 %v1653_v37, %v1652_v56  ;;  %v1692_v48 = vrot.slane %v1691_v26, 4 }
 0x1d1   :  { %v1655_v49 = vrot.slane %v1654_v46, 2  ;;  %v1693_v3 = vadd.f32 %v1692_v48, %v1691_v26 }
 0x1d3   :  { %v1656_v8 = vadd.f32 %v1655_v49, %v1654_v46  ;;  %v1694_v20 = vrot.slane %v1693_v3, 2 }
 0x1d5   :  { %v1657_v25 = vrot.slane %v1656_v8, 1  ;;  %v1695_v43 = vadd.f32 %v1694_v20, %v1693_v3 }
 0x1d7   :  { %v1658_v42 = vadd.f32 %v1657_v25, %v1656_v8  ;;  %v1696_v61 = vrot.slane %v1695_v43, 1 }
 0x1d9   :  { %v1660_v36 = vmul.f32 0.0078125, %v1658_v42  ;;  %v1697_v54 = vadd.f32 %v1696_v61, %v1695_v43 }
 0x1db   :  { %v1698_v31 = vmul.f32 0.0078125, %v1697_v54  ;;  %v1699_v62 = vmul.f32 %v1660_v36, %v1660_v36 }
 0x1dd   :  { %v1700_v38 = vsub.f32 %v1698_v31, %v1699_v62 }
 0x1df   :  { %v1701_v7 = vmax.f32 %v1700_v38, 0.0 }
 0x1e1   :  { %v1702_v53 = vadd.f32 1e-05, %v1701_v7 }
 0x1e3   :  { %4016 = vrsqrt.f32 %v1702_v53 }
 0x1ed   :  { %v4017_v22 = vpop.eup %4016 }
 0x1ee   :  { %v1704_v35 = vmul.f32 %v4017_v22, %v1636_v59 }
 0x1f0   :  { %v1705_v27 = vmul.f32 %v1704_v35, %v1660_v36  ;;  %v4925_v45 = vrot.slane %v1704_v35, %v4919_v39 }
 0x1f2   :  { %v1706_v6 = vsub.f32 %v1637_v18, %v1705_v27  ;;  %v1728_v56 = vmul.f32 %v4925_v45, %v1619_v12  ;;  %v1713_v34 = vmul.f32 %v4925_v45, %v4827_v41  ;;  %v1714_v50 = vmul.f32 %v4925_v45, %v4830_v2 }
 0x1f3   :  { %v1715_v37 = vmul.f32 %v4925_v45, %v4833_v23  ;;  %v1716_v26 = vmul.f32 %v4925_v45, %v4837_v28  ;;  %v1717_v46 = vmul.f32 %v4925_v45, %v4842_v0  ;;  %v1718_v48 = vmul.f32 %v4925_v45, %v4851_v11 }
 0x1f4   :  { %v4941_v12 = vrot.slane %v1706_v6, %v4919_v39  ;;  %v1719_v41 = vmul.f32 %v4925_v45, %v4860_v21  ;;  %v1720_v2 = vmul.f32 %v4925_v45, %v4862_v58  ;;  %v1721_v23 = vmul.f32 %v4925_v45, %v4870_v47  ;;  %v3984_v6 = vld [vmem:[#allocation7 + $0x180] ss:$12 sps:$4 sm:$0xff]  }
 0x1f5   :  { %v1722_v28 = vmul.f32 %v4925_v45, %v4874_v5  ;;  %v1723_v0 = vmul.f32 %v4925_v45, %v4886_v63  ;;  %v4955_v11 = vmul.f32 %v4925_v45, %v4892_v51  ;;  %v4959_v49 = vmul.f32 %v4925_v45, %v4898_v57 }
 0x1f6   :  { %v1750_v21 = vadd.f32 %v4941_v12, %v1728_v56  ;;  %v1735_v58 = vadd.f32 %v4941_v12, %v1713_v34  ;;  %v1736_v47 = vadd.f32 %v4941_v12, %v1714_v50  ;;  %v1737_v3 = vadd.f32 %v4941_v12, %v1715_v37 }
 0x1f7   :  { %v1738_v5 = vadd.f32 %v4941_v12, %v1716_v26  ;;  %v1739_v63 = vadd.f32 %v4941_v12, %v1717_v46  ;;  %v1740_v8 = vadd.f32 %v4941_v12, %v1718_v48  ;;  %v1741_v51 = vadd.f32 %v4941_v12, %v1719_v41  ;;  %v3989_v26 = vld [vmem:[#allocation7 + $0x19c] ss:$12 sps:$4 sm:$0xff]  }
 0x1f8   :  { %v4969_v20 = vmax.f32 %v1750_v21, 0.0  ;;  %v4971_v57 = vmax.f32 %v1735_v58, 0.0  ;;  %v4973_v25 = vmax.f32 %v1736_v47, 0.0  ;;  %v4975_v43 = vmax.f32 %v1737_v3, 0.0 }
 0x1f9   :  { %v4977_v42 = vmax.f32 %v1738_v5, 0.0  ;;  %v4979_v61 = vmax.f32 %v1739_v63, 0.0  ;;  %v4981_v36 = vmax.f32 %v1740_v8, 0.0  ;;  %v1742_v54 = vadd.f32 %v4941_v12, %v1720_v2  ;;  %v4000_v8 = vld [vmem:[#allocation7 + $0x1a0] ss:$12 sps:$4 sm:$0xff]  }
 0x1fa   :  { %v1782_v31 = vrot.slane %v4969_v20, 7  ;;  %v1830_v62 = vrot.slane %v4969_v20, 1  ;;  %v1767_v38 = vrot.slane %v4971_v57, 7  ;;  %v1768_v7 = vrot.slane %v4973_v25, 7 }
 0x1fb   :  { %v1871_v53 = vpack.c.bf16 %v4973_v25, %v4971_v57  ;;  %v1818_v59 = vrot.slane %v4977_v42, 1  ;;  %v1872_v22 = vpack.c.bf16 %v4977_v42, %v4975_v43  ;;  %v1769_v35 = vrot.slane %v4975_v43, 7 }
 0x1fc   :  { %v1797_v18 = vsel %vm5497_vm7, %v1767_v38, %v1768_v7  ;;  %v1798_v27 = vsel %vm5498_vm12, %v1782_v31, %v1767_v38  ;;  %v1770_v56 = vrot.slane %v4977_v42, 7  ;;  %v1819_v34 = vrot.slane %v4979_v61, 1  ;;  %vm5502_vm7 = vmmov %vm5500_vm4  ;;  %v3987_v38 = vld [vmem:[#allocation7 + $0x198] ss:$12 sps:$4 sm:$0xff]  }
 0x1fd   :  { %2399 = vmatprep.mubr.bf16.mxu1 %v1871_v53  ;;  %2625 = vmatprep.mubr.bf16.mxu0 %v1871_v53  ;;  %v3338_v50 = vpack.c.bf16 %v1797_v18, %v1798_v27  ;;  %v1796_v37 = vsel %vm5499_vm9, %v1768_v7, %v1769_v35  ;;  %v1873_v46 = vpack.c.bf16 %v4981_v36, %v4979_v61  ;;  %v1771_v48 = vrot.slane %v4979_v61, 7  ;;  %vm5503_vm12 = vmmov %vm5500_vm4  ;;  %v4010_v61 = vld [vmem:[#allocation7 + $0x200] ss:$12 sps:$4 sm:$0xff]  }
 0x1fe   :  { %v1795_v41 = vsel %vm5500_vm4, %v1769_v35, %v1770_v56  ;;  %v5015_v2 = vsel %vm5501_vm13, %v1818_v59, %v1819_v34  ;;  %v1772_v21 = vrot.slane %v4981_v36, 7  ;;  %v5018_v58 = vmax.f32 %v1741_v51, 0.0 }
 0x1ff   :  { %3339 = vmatmul.mubr.msk.bf16.vlgmr.msra.gmra.mrb[48].mxu1 %vm4269_vm3, %v3338_v50  ;;  %3419 = vmatmul.mubr.msk.bf16.vlgmr.msra.gmra.mrb[32].mxu0 %vm4269_vm3, %v3338_v50  ;;  %v3343_v47 = vpack.c.bf16 %v1795_v41, %v1796_v37  ;;  %v1794_v3 = vsel %vm5502_vm7, %v1770_v56, %v1771_v48  ;;  %v5026_v5 = vmax.f32 %v1742_v54, 0.0  ;;  %v1743_v63 = vadd.f32 %v4941_v12, %v1721_v23  ;;  %v3992_v54 = vld [vmem:[#allocation7 + $0x1b4] ss:$12 sps:$4 sm:$0xff]   ;;  %vm5504_vm3 = vmmov %vm5500_vm4 }
 0x200   :  { %2409 = vmatprep.mubr.bf16.mxu1 %v1872_v22  ;;  %2481 = vmatpush1.bf16.msra.mxu1 %v3984_v6  ;;  %v1793_v51 = vsel %vm5503_vm12, %v1771_v48, %v1772_v21  ;;  %v1773_v7 = vrot.slane %v5018_v58, 7  ;;  %v1744_v52 = vadd.f32 %v4941_v12, %v1722_v28  ;;  %v1745_v53 = vadd.f32 %v4941_v12, %v1723_v0  ;;  %vm5505_vm9 = vmmov %vm5504_vm3 }
 0x201   :  { %2633 = vmatprep.mubr.bf16.mxu0 %v1872_v22  ;;  %2482 = vmatprep.subr.bf16.mxu1 %v3989_v26  ;;  %v5034_v35 = vpack.c.bf16 %v1793_v51, %v1794_v3  ;;  %v5038_v23 = vpack.c.bf16 %v5026_v5, %v5018_v58  ;;  %v1774_v18 = vrot.slane %v5026_v5, 7  ;;  %v5041_v27 = vmax.f32 %v1743_v63, 0.0  ;;  %vm5506_vm4 = vmmov %vm5504_vm3  ;;  %v4004_v63 = vld [vmem:[#allocation7 + $0x1b8] ss:$12 sps:$4 sm:$0xff]  }
 0x202   :  { %v1792_v6 = vsel %vm5504_vm3, %v1772_v21, %v1773_v7  ;;  %v5045_v56 = vmax.f32 %v1744_v52, 0.0  ;;  %3720 = vmatpush3.bf16.msra.mxu0 %v4835_v30  ;;  %v1746_v28 = vadd.f32 %v4941_v12, %v4955_v11  ;;  %v5050_v0 = vmax.f32 %v1745_v53, 0.0  ;;  %v3990_v21 = vld [vmem:[#allocation7 + $0x1b0] ss:$12 sps:$4 sm:$0xff]   ;;  %v3995_v51 = vld [vmem:[#allocation7 + $0x1cc] ss:$12 sps:$4 sm:$0xff]   ;;  %vm5507_vm13 = vmmov %vm5504_vm3 }
 0x203   :  { %v1791_v22 = vsel %vm5505_vm9, %v1773_v7, %v1774_v18  ;;  %v1775_v50 = vrot.slane %v5041_v27, 7  ;;  %3721 = vmatprep.subr.bf16.mxu0 %v4000_v8  ;;  %v1726_v37 = vmul.f32 %v4925_v45, %v4904_v15  ;;  %v1747_v26 = vadd.f32 %v4941_v12, %v4959_v49  ;;  %vm5510_vm12 = vmmov %vm5504_vm3 }
 0x204   :  { %2483 = vmatpush1.bf16.msra.mxu1 %v3987_v38  ;;  %v5059_v48 = vpack.c.bf16 %v1791_v22, %v1792_v6  ;;  %v5063_v30 = vpack.c.bf16 %v5045_v56, %v5041_v27  ;;  %v1776_v11 = vrot.slane %v5045_v56, 7  ;;  %v5066_v41 = vmax.f32 %v1746_v28, 0.0  ;;  %vm5511_vm9 = vmmov %vm5504_vm3 }
 0x205   :  { %2484 = vmatprep.subr.bf16.mxu1 %v3992_v54  ;;  %v1790_v3 = vsel %vm5506_vm4, %v1774_v18, %v1775_v50  ;;  %v1777_v15 = vrot.slane %v5050_v0, 7  ;;  %v1748_v49 = vadd.f32 %v4941_v12, %v1726_v37  ;;  %v5072_v38 = vmax.f32 %v1747_v26, 0.0  ;;  %v5508_v18 = vld [vmem:[#allocation12_spill] sm:$0xff]  ;;  %v3993_v26 = vld [vmem:[#allocation7 + $0x1c8] ss:$12 sps:$4 sm:$0xff]  }
 0x206   :  { %v1789_v7 = vsel %vm5507_vm13, %v1775_v50, %v1776_v11  ;;  %v5078_v52 = vpack.c.bf16 %v5066_v41, %v5050_v0  ;;  %3722 = vmatpush3.bf16.msra.mxu0 %v4000_v8  ;;  %v1778_v53 = vrot.slane %v5066_v41, 7  ;;  %v1727_v54 = vmul.f32 %v4925_v45, %v4910_v55  ;;  %v4005_v50 = vld [vmem:[#allocation7 + $0x1d0] ss:$12 sps:$4 sm:$0xff]   ;;  %vm5513_vm13 = vmmov %vm5504_vm3 }
 0x207   :  { %vm5509_vm7 = vnez %v5508_v18  ;;  %v5087_v6 = vpack.c.bf16 %v1789_v7, %v1790_v3  ;;  %v1788_v28 = vsel %vm5510_vm12, %v1776_v11, %v1777_v15  ;;  %v5091_v22 = vmax.f32 %v1748_v49, 0.0  ;;  %3723 = vmatprep.subr.bf16.mxu0 %v4004_v63 }
 0x208   :  { %3344 = vmatmul.mubr.msk.bf16.gmra.mrb[52].mxu1 %vm5509_vm7, %v3343_v47  ;;  %3424 = vmatmul.mubr.msk.bf16.gmra.mrb[36].mxu0 %vm5509_vm7, %v3343_v47  ;;  %v1779_v8 = vrot.slane %v5072_v38, 7  ;;  %v1787_v55 = vsel %vm5504_vm3, %v1777_v15, %v1778_v53  ;;  %v1749_v45 = vadd.f32 %v4941_v12, %v1727_v54  ;;  %v1815_v37 = vrot.slane %v4971_v57, 1  ;;  %v3999_v12 = vld [vmem:[#allocation7 + $0x1e4] ss:$12 sps:$4 sm:$0xff]  }
 0x209   :  { %2419 = vmatprep.mubr.bf16.mxu1 %v1873_v46  ;;  %2641 = vmatprep.mubr.bf16.mxu0 %v1873_v46  ;;  %v1816_v47 = vrot.slane %v4973_v25, 1  ;;  %v5099_v3 = vpack.c.bf16 %v1787_v55, %v1788_v28  ;;  %v5103_v11 = vpack.c.bf16 %v5091_v22, %v5072_v38  ;;  %v1780_v46 = vrot.slane %v5091_v22, 7  ;;  %v3997_v55 = vld [vmem:[#allocation7 + $0x1e0] ss:$12 sps:$4 sm:$0xff]   ;;  %v4015_v57 = vld [vmem:[#allocation7 + $0x230] ss:$12 sps:$4 sm:$0xff]  }
 0x20a   :  { %2485 = vmatpush1.bf16.msra.mxu1 %v3990_v21  ;;  %v1786_v15 = vsel %vm5511_vm9, %v1778_v53, %v1779_v8  ;;  %3724 = vmatpush3.bf16.msra.mxu0 %v4004_v63  ;;  %v1765_v49 = vmax.f32 %v1749_v45, 0.0  ;;  %v1817_v25 = vrot.slane %v4975_v43, 1  ;;  %vm5512_vm4 = vcmp.lt.s32.totalorder %v4224_v17, 7  ;;  %v4003_v45 = vld [vmem:[#allocation7 + $0x1fc] ss:$12 sps:$4 sm:$0xff]  }
 0x20b   :  { %2486 = vmatprep.subr.bf16.mxu1 %v3995_v51  ;;  %v1845_v21 = vsel %vm5512_vm4, %v1815_v37, %v1816_v47  ;;  %v1820_v7 = vrot.slane %v4981_v36, 1  ;;  %3725 = vmatprep.subr.bf16.mxu0 %v4005_v50  ;;  %v1785_v54 = vsel %vm5513_vm13, %v1779_v8, %v1780_v46  ;;  %v1821_v18 = vrot.slane %v5018_v58, 1  ;;  %vm5514_vm7 = vmmov %vm5512_vm4  ;;  %v4009_v8 = vld [vmem:[#allocation7 + $0x1e8] ss:$12 sps:$4 sm:$0xff]  }
 0x20c   :  { %v1822_v51 = vrot.slane %v5026_v5, 1  ;;  %v1823_v63 = vrot.slane %v5041_v27, 1  ;;  %v5119_v53 = vpack.c.bf16 %v1785_v54, %v1786_v15  ;;  %v5122_v43 = vpack.c.bf16 %v4969_v20, %v1765_v49  ;;  %vm5515_vm12 = vmmov %vm5512_vm4  ;;  %v4011_v17 = vld [vmem:[#allocation7 + $0x228] ss:$12 sps:$4 sm:$0xff]  }
 0x20d   :  { %v1781_v28 = vrot.slane %v1765_v49, 7  ;;  %v1843_v36 = vsel %vm5514_vm7, %v1817_v25, %v1818_v59  ;;  %v1844_v58 = vsel %vm5515_vm12, %v1816_v47, %v1817_v25  ;;  %vm5516_vm3 = vmmov %vm5512_vm4  ;;  %vm5520_vm7 = vnez %v5432_v33 }
 0x20e   :  { %2487 = vmatpush1.bf16.msra.mxu1 %v3993_v26  ;;  %v5131_v5 = vpack.c.bf16 %v5015_v2, %v1843_v36  ;;  %v1840_v27 = vsel %vm5516_vm3, %v1820_v7, %v1821_v18  ;;  %vm5517_vm9 = vmmov %vm5516_vm3  ;;  %3726 = vmatpush3.bf16.msra.mxu0 %v4005_v50  ;;  %v5145_v47 = vpack.c.bf16 %v1844_v58, %v1845_v21  ;;  %v1824_v26 = vrot.slane %v5045_v56, 1  ;;  %v4006_v36 = vld [vmem:[#allocation7 + $0x210] ss:$12 sps:$4 sm:$0xff]   ;;  %v4013_v58 = vld [vmem:[#allocation7 + $0x22c] ss:$12 sps:$4 sm:$0xff]  }
 0x20f   :  { %v1841_v42 = vsel %vm5517_vm9, %v1819_v34, %v1820_v7  ;;  %2488 = vmatprep.subr.bf16.mxu1 %v3999_v12  ;;  %vm5518_vm4 = vmmov %vm5513_vm13  ;;  %v1839_v56 = vsel %vm5516_vm3, %v1821_v18, %v1822_v51  ;;  %v1827_v15 = vrot.slane %v5072_v38, 1  ;;  %v4001_v12 = vld [vmem:[#allocation7 + $0x1f8] ss:$12 sps:$4 sm:$0xff]   ;;  %3727 = vmatprep.subr.bf16.mxu0 %v4009_v8  ;;  %v1829_v21 = vrot.slane %v1765_v49, 1  ;;  %v4008_v7 = vld [vmem:[#allocation7 + $0x214] ss:$12 sps:$4 sm:$0xff]  }
 0x210   :  { %v1783_v59 = vsel %vm5518_vm4, %v1781_v28, %v1782_v31  ;;  %vm5519_vm13 = vmmov %vm5518_vm4  ;;  %3349 = vmatmul.mubr.msk.bf16.gmra.mrb[56].mxu1 %vm5520_vm7, %v5034_v35  ;;  %3429 = vmatmul.mubr.msk.bf16.gmra.mrb[40].mxu0 %vm5520_vm7, %v5034_v35  ;;  %v5156_v50 = vpack.c.bf16 %v1840_v27, %v1841_v42  ;;  %v1826_v35 = vrot.slane %v5066_v41, 1 }
 0x211   :  { %v1784_v2 = vsel %vm5519_vm13, %v1780_v46, %v1781_v28  ;;  %vm5521_vm12 = vmmov %vm5516_vm3  ;;  %v1825_v46 = vrot.slane %v5050_v0, 1  ;;  %2429 = vmatprep.mubr.bf16.mxu1 %v5038_v23  ;;  %2649 = vmatprep.mubr.bf16.mxu0 %v5038_v23  ;;  %v1828_v23 = vrot.slane %v5091_v22, 1 }
 0x212   :  { %v5154_v34 = vpack.c.bf16 %v1783_v59, %v1784_v2  ;;  %v1838_v31 = vsel %vm5521_vm12, %v1822_v51, %v1823_v63  ;;  %vm5522_vm9 = vmmov %vm5516_vm3  ;;  %2489 = vmatpush1.bf16.msra.mxu1 %v3997_v55  ;;  %3728 = vmatpush3.bf16.msra.mxu0 %v4009_v8  ;;  %v4014_v55 = vld [vmem:[#allocation7 + $0x218] ss:$12 sps:$4 sm:$0xff]  }
 0x213   :  { %v1837_v33 = vsel %vm5522_vm9, %v1823_v63, %v1824_v26  ;;  %v5169_v25 = vpack.c.bf16 %v1838_v31, %v1839_v56  ;;  %vm5523_vm4 = vmmov %vm5516_vm3  ;;  %2490 = vmatprep.subr.bf16.mxu1 %v4003_v45  ;;  %3729 = vmatprep.subr.bf16.mxu0 %v4010_v61  ;;  %v1833_v63 = vsel %vm5516_vm3, %v1827_v15, %v1828_v23 }
 0x214   :  { %v1836_v0 = vsel %vm5523_vm4, %v1824_v26, %v1825_v46  ;;  %vm5524_vm13 = vmmov %vm5516_vm3 }
 0x215   :  { %v3398_v54 = vpack.c.bf16 %v1836_v0, %v1837_v33  ;;  %v1834_v41 = vsel %vm5524_vm13, %v1826_v35, %v1827_v15  ;;  %vm5525_vm7 = vmmov %vm5516_vm3  ;;  %vm5529_vm13 = vnez %v5438_v14 }
 0x216   :  { %v1835_v38 = vsel %vm5525_vm7, %v1825_v46, %v1826_v35  ;;  %vm5526_vm12 = vmmov %vm5516_vm3  ;;  %2491 = vmatpush1.bf16.msra.mxu1 %v4001_v12  ;;  %3730 = vmatpush3.bf16.msra.mxu0 %v4010_v61  ;;  %vm5530_vm7 = vnez %v5444_v10 }
 0x217   :  { %v3403_v18 = vpack.c.bf16 %v1834_v41, %v1835_v38  ;;  %v1832_v51 = vsel %vm5526_vm12, %v1828_v23, %v1829_v21  ;;  %vm5527_vm9 = vmmov %vm5516_vm3  ;;  %2492 = vmatprep.subr.bf16.mxu1 %v4008_v7  ;;  %3731 = vmatprep.subr.bf16.mxu0 %v4014_v55  ;;  %vm5531_vm12 = vnez %v5446_v32 }
 0x218   :  { %v1831_v22 = vsel %vm5527_vm9, %v1829_v21, %v1830_v62  ;;  %v3408_v49 = vpack.c.bf16 %v1832_v51, %v1833_v63  ;;  %vm5528_vm4 = vmmov %vm5516_vm3  ;;  %3354 = vmatmul.mubr.msk.bf16.gmra.mrb[60].mxu1 %vm5529_vm13, %v5059_v48  ;;  %3434 = vmatmul.mubr.msk.bf16.gmra.mrb[44].mxu0 %vm5529_vm13, %v5059_v48 }
 0x219   :  { %v1846_v28 = vsel %vm5528_vm4, %v1830_v62, %v1815_v37  ;;  %2439 = vmatprep.mubr.bf16.mxu1 %v5063_v30  ;;  %2657 = vmatprep.mubr.bf16.mxu0 %v5063_v30 }
 0x21a   :  { %v3413_v8 = vpack.c.bf16 %v1846_v28, %v1831_v22  ;;  %2493 = vmatpush1.bf16.msra.mxu1 %v4006_v36  ;;  %3732 = vmatpush3.bf16.msra.mxu0 %v4014_v55 }
 0x21b   :  { %2494 = vmatprep.subr.bf16.mxu1 %v4013_v58  ;;  %3733 = vmatprep.subr.bf16.mxu0 %v4015_v57 }
 0x21e   :  { %2495 = vmatpush1.bf16.msra.mxu1 %v4011_v17  ;;  %3734 = vmatpush3.bf16.msra.mxu0 %v4015_v57 }
 0x220   :  { %3359 = vmatmul.mubr.msk.bf16.gmra.mrb[64].mxu1 %vm5530_vm7, %v5087_v6  ;;  %3439 = vmatmul.mubr.msk.bf16.gmra.mrb[48].mxu0 %vm5530_vm7, %v5087_v6 }
 0x221   :  { %2449 = vmatprep.mubr.bf16.mxu1 %v5078_v52  ;;  %2665 = vmatprep.mubr.bf16.mxu0 %v5078_v52 }
 0x228   :  { %3364 = vmatmul.mubr.msk.bf16.gmra.mrb[68].mxu1 %vm5531_vm12, %v5099_v3  ;;  %3444 = vmatmul.mubr.msk.bf16.gmra.mrb[52].mxu0 %vm5531_vm12, %v5099_v3 }
 0x229   :  { %2459 = vmatprep.mubr.bf16.mxu1 %v5103_v11  ;;  %2673 = vmatprep.mubr.bf16.mxu0 %v5103_v11 }
 0x230   :  { %3369 = vmatmul.mubr.msk.bf16.gmra.mrb[72].mxu1 %vm4508_vm8, %v5119_v53  ;;  %3449 = vmatmul.mubr.msk.bf16.gmra.mrb[56].mxu0 %vm4508_vm8, %v5119_v53 }
 0x231   :  { %2469 = vmatprep.mubr.bf16.mxu1 %v5122_v43  ;;  %2681 = vmatprep.mubr.bf16.mxu0 %v5122_v43 }
 0x238   :  { %3374 = vmatmul.mubr.msk.bf16.gmra.mrb[76].mxu1 %vm4554_vm1, %v5154_v34  ;;  %3454 = vmatmul.mubr.msk.bf16.gmra.mrb[60].mxu0 %vm4554_vm1, %v5154_v34 }
 0x239   :  { %3735 = vmatprep.mubr.msk.bf16.mxu0 %vm4562_vm5, %v5145_v47  ;;  %2512 = vmatprep.mubr.bf16.mxu1 %v4137_v4 }
 0x240   :  { %3379 = vmatmul.mubr.msk.bf16.vlgmr.msra.gmra.mrb[48].mxu1 %vm4562_vm5, %v5145_v47  ;;  %3736 = vmatmul.mubr.msk.bf16.vlgmr.msra.gmra.mrb[64].mxu0 %vm4612_vm15, %v5131_v5 }
 0x241   :  { %3739 = vmatprep.mubr.msk.bf16.mxu0 %vm4618_vm0, %v5156_v50  ;;  %2522 = vmatprep.mubr.bf16.mxu1 %v4137_v4 }
 0x248   :  { %3384 = vmatmul.mubr.msk.bf16.gmra.mrb[52].mxu1 %vm4612_vm15, %v5131_v5  ;;  %3740 = vmatmul.mubr.msk.bf16.gmra.mrb[68].mxu0 %vm4670_vm2, %v5169_v25 }
 0x249   :  { %3743 = vmatprep.mubr.msk.bf16.mxu0 %vm4676_vm10, %v3398_v54  ;;  %2532 = vmatprep.mubr.bf16.mxu1 %v4137_v4 }
 0x250   :  { %3389 = vmatmul.mubr.msk.bf16.gmra.mrb[56].mxu1 %vm4618_vm0, %v5156_v50  ;;  %3744 = vmatmul.mubr.msk.bf16.gmra.mrb[72].mxu0 %vm4704_vm11, %v3403_v18 }
 0x251   :  { %3747 = vmatprep.mubr.msk.bf16.mxu0 %vm4709_vm6, %v3408_v49  ;;  %2542 = vmatprep.mubr.bf16.mxu1 %v4137_v4 }
 0x258   :  { %3394 = vmatmul.mubr.msk.bf16.gmra.mrb[60].mxu1 %vm4670_vm2, %v5169_v25  ;;  %3748 = vmatmul.mubr.msk.bf16.gmra.mrb[76].mxu0 %vm4731_vm14, %v3413_v8 }
 0x259   :  { %2552 = vmatprep.mubr.bf16.mxu1 %v4137_v4 }
 0x260   :  { %3399 = vmatmul.mubr.msk.bf16.gmra.mrb[64].mxu1 %vm4676_vm10, %v3398_v54 }
 0x261   :  { %2562 = vmatprep.mubr.bf16.mxu1 %v4137_v4 }
 0x268   :  { %3404 = vmatmul.mubr.msk.bf16.gmra.mrb[68].mxu1 %vm4704_vm11, %v3403_v18 }
 0x269   :  { %2572 = vmatprep.mubr.bf16.mxu1 %v4137_v4 }
 0x270   :  { %3409 = vmatmul.mubr.msk.bf16.gmra.mrb[72].mxu1 %vm4709_vm6, %v3408_v49 }
 0x271   :  { %2582 = vmatprep.mubr.bf16.mxu1 %v4137_v4 }
 0x278   :  { %3414 = vmatmul.mubr.msk.bf16.gmra.mrb[76].mxu1 %vm4731_vm14, %v3413_v8 }
 0x2d2   :  { %v3623_v14 = vpop.f32.mrb[32].mxu0 }
 0x2d3   :  { %v3624_v10 = vpop.f32.mrb[33].mxu0 }
 0x2d4   :  { %v3626_v32 = vpop.f32.mrb[34].mxu0 }
 0x2d5   :  { %v3627_v40 = vpop.f32.mrb[35].mxu0 }
 0x2d6   :  { %v3628_v13 = vadd.f32 %v3627_v40, %v3626_v32 }
 0x2db   :  { %v3629_v19 = vpop.f32.mrb[36].mxu0 }
 0x2dc   :  { %v3630_v60 = vpop.f32.mrb[37].mxu0 }
 0x2dd   :  { %v3631_v29 = vadd.f32 %v3630_v60, %v3629_v19  ;;  %v3632_v16 = vpop.f32.mrb[38].mxu0 }
 0x2de   :  { %v3633_v44 = vpop.f32.mrb[39].mxu0 }
 0x2df   :  { %v3634_v24 = vadd.f32 %v3633_v44, %v3632_v16 }
 0x2e3   :  { %v3635_v20 = vpop.f32.mrb[40].mxu0 }
 0x2e4   :  { %v3636_v62 = vpop.f32.mrb[41].mxu0 }
 0x2e5   :  { %v3637_v1 = vadd.f32 %v3636_v62, %v3635_v20  ;;  %v3638_v48 = vpop.f32.mrb[42].mxu0 }
 0x2e6   :  { %v3639_v30 = vpop.f32.mrb[43].mxu0 }
 0x2e7   :  { %v3640_v4 = vadd.f32 %v3639_v30, %v3638_v48 }
 0x2eb   :  { %v3641_v52 = vpop.f32.mrb[44].mxu0 }
 0x2ec   :  { %v3642_v9 = vpop.f32.mrb[45].mxu0 }
 0x2ed   :  { %v3643_v6 = vadd.f32 %v3642_v9, %v3641_v52  ;;  %v3644_v37 = vpop.f32.mrb[46].mxu0 }
 0x2ee   :  { %v3645_v3 = vpop.f32.mrb[47].mxu0 }
 0x2ef   :  { %v3646_v11 = vadd.f32 %v3645_v3, %v3644_v37 }
 0x2f3   :  { %v3647_v53 = vpop.f32.mrb[48].mxu0 }
 0x2f4   :  { %v3648_v43 = vpop.f32.mrb[49].mxu0 }
 0x2f5   :  { %v3650_v5 = vpop.f32.mrb[50].mxu0 }
 0x2f6   :  { %v3651_v27 = vpop.f32.mrb[51].mxu0 }
 0x2f7   :  { %v5278_v42 = vadd.f32 %v3651_v27, %v3650_v5 }
 0x2fb   :  { %v3653_v45 = vpop.f32.mrb[52].mxu0 }
 0x2fc   :  { %v3654_v59 = vpop.f32.mrb[53].mxu0 }
 0x2fd   :  { %v3655_v2 = vadd.f32 %v3654_v59, %v3653_v45  ;;  %v3656_v47 = vpop.f32.mrb[54].mxu0 }
 0x2fe   :  { %v3657_v26 = vpop.f32.mrb[55].mxu0 }
 0x2ff   :  { %v3658_v61 = vadd.f32 %v3657_v26, %v3656_v47 }
 0x303   :  { %v3659_v34 = vpop.f32.mrb[56].mxu0 }
 0x304   :  { %v3660_v50 = vpop.f32.mrb[57].mxu0 }
 0x305   :  { %v5280_v31 = vadd.f32 %v3660_v50, %v3659_v34  ;;  %v3662_v46 = vpop.f32.mrb[58].mxu0 }
 0x306   :  { %v3663_v56 = vpop.f32.mrb[59].mxu0 }
 0x307   :  { %v5282_v33 = vadd.f32 %v3663_v56, %v3662_v46 }
 0x30b   :  { %v3665_v35 = vpop.f32.mrb[60].mxu0 }
 0x30c   :  { %v3666_v15 = vpop.f32.mrb[61].mxu0 }
 0x30d   :  { %v5284_v12 = vadd.f32 %v3666_v15, %v3665_v35  ;;  %v3668_v25 = vpop.f32.mrb[62].mxu0 }
 0x30e   :  { %v3669_v0 = vpop.f32.mrb[63].mxu0 }
 0x30f   :  { %v5286_v23 = vadd.f32 %v3669_v0, %v3668_v25 }
 0x313   :  { %v2514_v21 = vpop.f32.mrb[48].mxu1  ;;  %v3737_v7 = vpop.f32.mrb[64].mxu0 }
 0x314   :  { %v2733_v54 = vadd.f32 %v3737_v7, %v3631_v29  ;;  %v2516_v41 = vpop.f32.mrb[49].mxu1  ;;  %v2724_v38 = vpop.f32.mrb[65].mxu0 }
 0x315   :  { %v2518_v18 = vpop.f32.mrb[50].mxu1  ;;  %v3738_v51 = vpop.f32.mrb[66].mxu0 }
 0x316   :  { %v2736_v63 = vadd.f32 %v3738_v51, %v3634_v24  ;;  %v2520_v22 = vpop.f32.mrb[51].mxu1  ;;  %v2727_v49 = vpop.f32.mrb[67].mxu0 }
 0x317   :  { %v2820_v28 = vadd.f32 %v2520_v22, %v2514_v21  ;;  %v2728_v36 = vadd.f32 %v3628_v13, %v2727_v49 }
 0x319   :  { %v5288_v55 = vadd.f32 %v2820_v28, %v2733_v54  ;;  %v5290_v8 = vadd.f32 %v2728_v36, %v2516_v41 }
 0x31b   :  { %v2524_v58 = vpop.f32.mrb[52].mxu1  ;;  %v3741_v57 = vpop.f32.mrb[68].mxu0  ;;  %v2876_v62 = vmul.f32 %v5288_v55, %v5288_v55  ;;  %v2875_v48 = vmul.f32 %v5290_v8, %v5290_v8  ;;  %v2853_v52 = vadd.f32 %v5288_v55, %v5290_v8 }
 0x31c   :  { %v2749_v17 = vadd.f32 %v3741_v57, %v3643_v6  ;;  %v2526_v14 = vpop.f32.mrb[53].mxu1  ;;  %v2740_v10 = vpop.f32.mrb[69].mxu0 }
 0x31d   :  { %v2821_v32 = vadd.f32 %v2526_v14, %v2518_v18  ;;  %v2741_v40 = vadd.f32 %v3637_v1, %v2740_v10  ;;  %v2528_v19 = vpop.f32.mrb[54].mxu1  ;;  %v3742_v60 = vpop.f32.mrb[70].mxu0  ;;  %v2891_v37 = vadd.f32 %v2876_v62, %v2875_v48 }
 0x31e   :  { %v2752_v29 = vadd.f32 %v3742_v60, %v3646_v11  ;;  %v2530_v16 = vpop.f32.mrb[55].mxu1  ;;  %v2743_v44 = vpop.f32.mrb[71].mxu0 }
 0x31f   :  { %v5292_v24 = vadd.f32 %v2821_v32, %v2736_v63  ;;  %v2822_v20 = vadd.f32 %v2530_v16, %v2524_v58  ;;  %v2744_v13 = vadd.f32 %v3640_v4, %v2743_v44 }
 0x321   :  { %v5298_v30 = vadd.f32 %v2822_v20, %v2741_v40  ;;  %v2877_v1 = vmul.f32 %v5292_v24, %v5292_v24  ;;  %v2854_v53 = vadd.f32 %v2853_v52, %v5292_v24 }
 0x323   :  { %v2534_v9 = vpop.f32.mrb[56].mxu1  ;;  %v3745_v6 = vpop.f32.mrb[72].mxu0  ;;  %v2892_v45 = vadd.f32 %v2891_v37, %v2877_v1  ;;  %v2878_v34 = vmul.f32 %v5298_v30, %v5298_v30 }
 0x324   :  { %v2765_v3 = vadd.f32 %v3745_v6, %v3655_v2  ;;  %v2536_v11 = vpop.f32.mrb[57].mxu1  ;;  %v2756_v4 = vpop.f32.mrb[73].mxu0  ;;  %v2855_v2 = vadd.f32 %v2854_v53, %v5298_v30 }
 0x325   :  { %v2823_v43 = vadd.f32 %v2536_v11, %v2528_v19  ;;  %v2538_v5 = vpop.f32.mrb[58].mxu1  ;;  %v3746_v27 = vpop.f32.mrb[74].mxu0  ;;  %v2893_v25 = vadd.f32 %v2892_v45, %v2878_v34 }
 0x326   :  { %v2768_v59 = vadd.f32 %v3746_v27, %v3658_v61  ;;  %v2540_v47 = vpop.f32.mrb[59].mxu1  ;;  %v2759_v26 = vpop.f32.mrb[75].mxu0 }
 0x327   :  { %v5307_v50 = vadd.f32 %v2823_v43, %v2744_v13  ;;  %v2824_v46 = vadd.f32 %v2540_v47, %v2534_v9  ;;  %v2760_v56 = vadd.f32 %v5278_v42, %v2759_v26 }
 0x329   :  { %v2879_v35 = vmul.f32 %v5307_v50, %v5307_v50  ;;  %v5313_v15 = vadd.f32 %v2824_v46, %v2749_v17  ;;  %v2856_v61 = vadd.f32 %v2855_v2, %v5307_v50 }
 0x32b   :  { %v2544_v0 = vpop.f32.mrb[60].mxu1  ;;  %v3749_v21 = vpop.f32.mrb[76].mxu0  ;;  %v2894_v38 = vadd.f32 %v2893_v25, %v2879_v35  ;;  %v2880_v42 = vmul.f32 %v5313_v15, %v5313_v15  ;;  %v2857_v58 = vadd.f32 %v2856_v61, %v5313_v15 }
 0x32c   :  { %v2781_v7 = vadd.f32 %v3749_v21, %v5284_v12  ;;  %v2546_v54 = vpop.f32.mrb[61].mxu1  ;;  %v2772_v41 = vpop.f32.mrb[77].mxu0 }
 0x32d   :  { %v2825_v18 = vadd.f32 %v2546_v54, %v2538_v5  ;;  %v2773_v51 = vadd.f32 %v5280_v31, %v2772_v41  ;;  %v2548_v63 = vpop.f32.mrb[62].mxu1  ;;  %v3750_v22 = vpop.f32.mrb[78].mxu0  ;;  %v2895_v14 = vadd.f32 %v2894_v38, %v2880_v42 }
 0x32e   :  { %v2784_v49 = vadd.f32 %v3750_v22, %v5286_v23  ;;  %v2550_v28 = vpop.f32.mrb[63].mxu1  ;;  %v2775_v36 = vpop.f32.mrb[79].mxu0 }
 0x32f   :  { %v5322_v57 = vadd.f32 %v2825_v18, %v2752_v29  ;;  %v5324_v12 = vadd.f32 %v2550_v28, %v2544_v0  ;;  %v2776_v17 = vadd.f32 %v5282_v33, %v2775_v36 }
 0x331   :  { %v2881_v10 = vmul.f32 %v5322_v57, %v5322_v57  ;;  %v2858_v31 = vadd.f32 %v2857_v58, %v5322_v57  ;;  %v2882_v60 = vmul.f32 %v5324_v12, %v5324_v12 }
 0x333   :  { %v2896_v32 = vadd.f32 %v2895_v14, %v2881_v10  ;;  %v2554_v40 = vpop.f32.mrb[64].mxu1  ;;  %v2859_v23 = vadd.f32 %v2858_v31, %v5324_v12 }
 0x334   :  { %v2556_v19 = vpop.f32.mrb[65].mxu1 }
 0x335   :  { %v5333_v29 = vadd.f32 %v2760_v56, %v2556_v19  ;;  %v2558_v16 = vpop.f32.mrb[66].mxu1  ;;  %v2897_v20 = vadd.f32 %v2896_v32, %v2882_v60 }
 0x336   :  { %v2560_v44 = vpop.f32.mrb[67].mxu1 }
 0x337   :  { %v2860_v33 = vadd.f32 %v2859_v23, %v5333_v29  ;;  %v2883_v13 = vmul.f32 %v5333_v29, %v5333_v29  ;;  %v2828_v62 = vadd.f32 %v2560_v44, %v2554_v40 }
 0x339   :  { %v2898_v48 = vadd.f32 %v2897_v20, %v2883_v13  ;;  %v5338_v1 = vadd.f32 %v2828_v62, %v2765_v3 }
 0x33b   :  { %v2861_v52 = vadd.f32 %v2860_v33, %v5338_v1  ;;  %v2884_v9 = vmul.f32 %v5338_v1, %v5338_v1  ;;  %v2564_v6 = vpop.f32.mrb[68].mxu1 }
 0x33c   :  { %v2566_v37 = vpop.f32.mrb[69].mxu1 }
 0x33d   :  { %v2899_v11 = vadd.f32 %v2898_v48, %v2884_v9  ;;  %v2829_v4 = vadd.f32 %v2566_v37, %v2558_v16  ;;  %v2568_v53 = vpop.f32.mrb[70].mxu1 }
 0x33e   :  { %v2570_v43 = vpop.f32.mrb[71].mxu1 }
 0x33f   :  { %v5343_v5 = vadd.f32 %v2829_v4, %v2768_v59  ;;  %v2830_v27 = vadd.f32 %v2570_v43, %v2564_v6 }
 0x341   :  { %v2862_v45 = vadd.f32 %v2861_v52, %v5343_v5  ;;  %v2885_v3 = vmul.f32 %v5343_v5, %v5343_v5  ;;  %v5348_v47 = vadd.f32 %v2830_v27, %v2773_v51 }
 0x343   :  { %v2900_v26 = vadd.f32 %v2899_v11, %v2885_v3  ;;  %v2863_v34 = vadd.f32 %v2862_v45, %v5348_v47  ;;  %v2886_v46 = vmul.f32 %v5348_v47, %v5348_v47  ;;  %v2574_v56 = vpop.f32.mrb[72].mxu1  ;;  %v2851_v45 = vld [vmem:[%s5393_s5] sm:$0x1]  ;;  %s4138_s5 = smov [#allocation8]  }
 0x344   :  { %v2576_v2 = vpop.f32.mrb[73].mxu1 }
 0x345   :  { %v2901_v35 = vadd.f32 %v2900_v26, %v2886_v46  ;;  %v2831_v25 = vadd.f32 %v2576_v2, %v2568_v53  ;;  %v2578_v59 = vpop.f32.mrb[74].mxu1 }
 0x346   :  { %v2580_v61 = vpop.f32.mrb[75].mxu1 }
 0x347   :  { %v2847_v0 = vadd.f32 %v2831_v25, %v2776_v17  ;;  %v2832_v21 = vadd.f32 %v2580_v61, %v2574_v56 }
 0x349   :  { %v2864_v54 = vadd.f32 %v2863_v34, %v2847_v0  ;;  %v2887_v41 = vmul.f32 %v2847_v0, %v2847_v0  ;;  %v2848_v38 = vadd.f32 %v2832_v21, %v2781_v7  ;;  %v2852_v34 = vld [vmem:[%s5394_s6] sm:$0x1]  ;;  %s3018_s6 = sshll.u32 %s4138_s5, 4  ;;  %s3019_s6 = int_to_ptr.vmem [resolvable:$true] %s3018_s6 }
 0x34a   :  { %s4102_s21 = scalar_lea.vmem %s3019_s6, 2048  ;;  %p4107_p11 = scmp.lt.s32.totalorder %s3019_s6, %s3019_s6 }
 0x34b   :  { %v2902_v42 = vadd.f32 %v2901_v35, %v2887_v41  ;;  %v2865_v18 = vadd.f32 %v2864_v54, %v2848_v38  ;;  %v2888_v51 = vmul.f32 %v2848_v38, %v2848_v38  ;;  %v2584_v63 = vpop.f32.mrb[76].mxu1  ;;  %p4103_p10 = scmp.ne.s32.totalorder %s3019_s6, %s4102_s21  ;;  %p4108_p12 = scmp.lt.s32.totalorder %s4102_s21, %s4102_s21 }
 0x34c   :  { %v2586_v22 = vpop.f32.mrb[77].mxu1 }
 0x34d   :  { %v2903_v28 = vadd.f32 %v2902_v42, %v2888_v51  ;;  %v2833_v36 = vadd.f32 %v2586_v22, %v2578_v59  ;;  %v2588_v58 = vpop.f32.mrb[78].mxu1  ;;  %p4109_p13 = por %p4108_p12, %p4107_p11 }
 0x34e   :  { %v2590_v14 = vpop.f32.mrb[79].mxu1 }
 0x34f   :  { %v2849_v10 = vadd.f32 %v2833_v36, %v2784_v49  ;;  %v2834_v31 = vadd.f32 %v2590_v14, %v2584_v63  ;;  %p4110_p0 = pnand %p4109_p13, %p4103_p10 }
 0x351   :  { %v2889_v32 = vmul.f32 %v2849_v10, %v2849_v10  ;;  %v2866_v40 = vadd.f32 %v2865_v18, %v2849_v10  ;;  %v2890_v23 = vmul.f32 %v2834_v31, %v2834_v31 }
 0x353   :  { %v2867_v19 = vadd.f32 %v2866_v40, %v2834_v31  ;;  %v2904_v17 = vadd.f32 %v2903_v28, %v2889_v32 }
 0x355   :  { %v2868_v60 = vrot.slane %v2867_v19, 4  ;;  %v2905_v16 = vadd.f32 %v2904_v17, %v2890_v23 }
 0x357   :  { %v2869_v44 = vadd.f32 %v2868_v60, %v2867_v19  ;;  %v2906_v7 = vrot.slane %v2905_v16, 4  ;;  %v4022_v60 = vld [vmem:[#allocation2 + $0x8] sm:$0xff] }
 0x359   :  { %v2870_v20 = vrot.slane %v2869_v44, 2  ;;  %v2907_v33 = vadd.f32 %v2906_v7, %v2905_v16 }
 0x35b   :  { %v2871_v13 = vadd.f32 %v2870_v20, %v2869_v44  ;;  %v2908_v62 = vrot.slane %v2907_v33, 2  ;;  %v4023_v44 = vld [vmem:[#allocation2 + $0x10] sm:$0xff]  ;;  %v4024_v20 = vld [vmem:[#allocation2 + $0x18] sm:$0xff] }
 0x35d   :  { %v2872_v48 = vrot.slane %v2871_v13, 1  ;;  %v2909_v52 = vadd.f32 %v2908_v62, %v2907_v33 }
 0x35f   :  { %v2873_v9 = vadd.f32 %v2872_v48, %v2871_v13  ;;  %v2910_v6 = vrot.slane %v2909_v52, 1  ;;  %v4025_v13 = vld [vmem:[#allocation2 + $0x20] sm:$0xff]  ;;  %v4026_v48 = vld [vmem:[#allocation2 + $0x28] sm:$0xff] }
 0x361   :  { %v2874_v37 = vmul.f32 0.0078125, %v2873_v9  ;;  %v2911_v49 = vadd.f32 %v2910_v6, %v2909_v52  ;;  %v4027_v9 = vld [vmem:[#allocation2 + $0x30] sm:$0xff] }
 0x363   :  { %v2912_v11 = vmul.f32 0.0078125, %v2911_v49  ;;  %v2913_v4 = vmul.f32 %v2874_v37, %v2874_v37 }
 0x365   :  { %v2914_v53 = vsub.f32 %v2912_v11, %v2913_v4  ;;  %v4029_v11 = vld [vmem:[#allocation2 + $0x40] sm:$0xff] }
 0x367   :  { %v2915_v43 = vmax.f32 %v2914_v53, 0.0  ;;  %v4030_v53 = vld [vmem:[#allocation2 + $0x48] sm:$0xff] }
 0x369   :  { %v2916_v27 = vadd.f32 1e-05, %v2915_v43 }
 0x36b   :  { %4018 = vrsqrt.f32 %v2916_v27  ;;  %v4031_v27 = vld [vmem:[#allocation2 + $0x50] sm:$0xff] }
 0x375   :  { %v4019_v3 = vpop.eup %4018 }
 0x376   :  { %v2918_v26 = vmul.f32 %v4019_v3, %v2851_v45  ;;  %v4032_v3 = vld [vmem:[#allocation2 + $0x58] sm:$0xff] }
 0x378   :  { %v2919_v46 = vmul.f32 %v2918_v26, %v2874_v37  ;;  %v2925_v56 = vrot.slane %v2918_v26, %v4919_v39  ;;  %v4028_v37 = vld [vmem:[#allocation2 + $0x38] sm:$0xff] }
 0x37a   :  { %v2920_v2 = vsub.f32 %v2852_v34, %v2919_v46  ;;  %v2942_v35 = vmul.f32 %v2925_v56, %v2834_v31  ;;  %v2927_v25 = vmul.f32 %v2925_v56, %v5290_v8  ;;  %v2928_v59 = vmul.f32 %v2925_v56, %v5288_v55  ;;  %v4033_v34 = vld [vmem:[#allocation2 + $0x60] sm:$0xff] }
 0x37b   :  { %v2929_v61 = vmul.f32 %v2925_v56, %v5292_v24  ;;  %v2930_v21 = vmul.f32 %v2925_v56, %v5298_v30  ;;  %v2931_v54 = vmul.f32 %v2925_v56, %v5307_v50  ;;  %v2932_v41 = vmul.f32 %v2925_v56, %v5313_v15 }
 0x37c   :  { %v2947_v42 = vrot.slane %v2920_v2, %v4919_v39  ;;  %v2933_v18 = vmul.f32 %v2925_v56, %v5322_v57  ;;  %v2934_v51 = vmul.f32 %v2925_v56, %v5324_v12  ;;  %v2935_v63 = vmul.f32 %v2925_v56, %v5333_v29  ;;  %v4020_v57 = vld [vmem:[#allocation2 + $0x78] sm:$0xff] }
 0x37d   :  { %v2936_v8 = vmul.f32 %v2925_v56, %v5338_v1  ;;  %v2937_v55 = vmul.f32 %v2925_v56, %v5343_v5  ;;  %v2938_v24 = vmul.f32 %v2925_v56, %v5348_v47  ;;  %v2939_v22 = vmul.f32 %v2925_v56, %v2847_v0 }
 0x37e   :  { %v2964_v30 = vadd.f32 %v2947_v42, %v2942_v35  ;;  %v2940_v28 = vmul.f32 %v2925_v56, %v2848_v38  ;;  %v2941_v50 = vmul.f32 %v2925_v56, %v2849_v10  ;;  %v2949_v36 = vadd.f32 %v2947_v42, %v2927_v25  ;;  %v4021_v38 = vld [vmem:[#allocation2] sm:$0xff]  ;;  %v4034_v56 = vld [vmem:[#allocation2 + $0x68] sm:$0xff]  ;;  %v4035_v35 = vld [vmem:[#allocation2 + $0x70] sm:$0xff] }
 0x37f   :  { %v2950_v15 = vadd.f32 %v2947_v42, %v2928_v59  ;;  %v2951_v58 = vadd.f32 %v2947_v42, %v2929_v61  ;;  %v2952_v39 = vadd.f32 %v2947_v42, %v2930_v21  ;;  %v2953_v14 = vadd.f32 %v2947_v42, %v2931_v54 }
 0x380   :  { %v2980_v31 = vadd.f32 %v4020_v57, %v2964_v30  ;;  %v2954_v12 = vadd.f32 %v2947_v42, %v2932_v41  ;;  %v2955_v32 = vadd.f32 %v2947_v42, %v2933_v18  ;;  %v2956_v29 = vadd.f32 %v2947_v42, %v2934_v51 }
 0x381   :  { %v2957_v40 = vadd.f32 %v2947_v42, %v2935_v63  ;;  %v2958_v1 = vadd.f32 %v2947_v42, %v2936_v8  ;;  %v2959_v19 = vadd.f32 %v2947_v42, %v2937_v55  ;;  %v2960_v5 = vadd.f32 %v2947_v42, %v2938_v24 }
 0x382   :  { %v2996_v23 = vmax.f32 %v2980_v31, 0.0  ;;  %v2961_v47 = vadd.f32 %v2947_v42, %v2939_v22  ;;  %v2962_v0 = vadd.f32 %v2947_v42, %v2940_v28  ;;  %v2963_v17 = vadd.f32 %v2947_v42, %v2941_v50 }
 0x383   :  { %v2965_v10 = vadd.f32 %v4021_v38, %v2949_v36  ;;  %v2966_v16 = vadd.f32 %v4022_v60, %v2950_v15  ;;  %v2967_v7 = vadd.f32 %v4023_v44, %v2951_v58  ;;  %v2968_v33 = vadd.f32 %v4024_v20, %v2952_v39 }
 0x384   :  { %3012 = vst [vmem:[#allocation8 + $0x78] sm:$0xff] %v2996_v23  ;;  %v2969_v62 = vadd.f32 %v4025_v13, %v2953_v14  ;;  %v2970_v52 = vadd.f32 %v4026_v48, %v2954_v12  ;;  %v2971_v6 = vadd.f32 %v4027_v9, %v2955_v32  ;;  %v2972_v49 = vadd.f32 %v4028_v37, %v2956_v29 }
 0x385   :  { %v2973_v4 = vadd.f32 %v4029_v11, %v2957_v40  ;;  %v2974_v43 = vadd.f32 %v4030_v53, %v2958_v1  ;;  %v2975_v45 = vadd.f32 %v4031_v27, %v2959_v19  ;;  %v2976_v26 = vadd.f32 %v4032_v3, %v2960_v5 }
 0x386   :  { %v2977_v46 = vadd.f32 %v4033_v34, %v2961_v47  ;;  %v2978_v2 = vadd.f32 %v4034_v56, %v2962_v0  ;;  %v2979_v25 = vadd.f32 %v4035_v35, %v2963_v17  ;;  %v2981_v59 = vmax.f32 %v2965_v10, 0.0 }
 0x387   :  { %v2982_v61 = vmax.f32 %v2966_v16, 0.0  ;;  %v2983_v21 = vmax.f32 %v2967_v7, 0.0  ;;  %v2984_v54 = vmax.f32 %v2968_v33, 0.0  ;;  %v2985_v41 = vmax.f32 %v2969_v62, 0.0 }
 0x388   :  { %v2986_v42 = vmax.f32 %v2970_v52, 0.0  ;;  %v2987_v18 = vmax.f32 %v2971_v6, 0.0  ;;  %v2988_v51 = vmax.f32 %v2972_v49, 0.0  ;;  %v2989_v63 = vmax.f32 %v2973_v4, 0.0  ;;  %2997 = vst [vmem:[#allocation8] sm:$0xff] %v2981_v59 }
 0x389   :  { %v2990_v8 = vmax.f32 %v2974_v43, 0.0  ;;  %v2991_v55 = vmax.f32 %v2975_v45, 0.0  ;;  %v2992_v24 = vmax.f32 %v2976_v26, 0.0  ;;  %v2993_v22 = vmax.f32 %v2977_v46, 0.0  ;;  %2998 = vst [vmem:[#allocation8 + $0x8] sm:$0xff] %v2982_v61  ;;  %2999 = vst [vmem:[#allocation8 + $0x10] sm:$0xff] %v2983_v21 }
 0x38a   :  { %3000 = vst [vmem:[#allocation8 + $0x18] sm:$0xff] %v2984_v54  ;;  %3001 = vst [vmem:[#allocation8 + $0x20] sm:$0xff] %v2985_v41  ;;  %v2994_v30 = vmax.f32 %v2978_v2, 0.0  ;;  %v2995_v28 = vmax.f32 %v2979_v25, 0.0 }
 0x38b   :  { %3002 = vst [vmem:[#allocation8 + $0x28] sm:$0xff] %v2986_v42  ;;  %3003 = vst [vmem:[#allocation8 + $0x30] sm:$0xff] %v2987_v18 }
 0x38c   :  { %3004 = vst [vmem:[#allocation8 + $0x38] sm:$0xff] %v2988_v51  ;;  %3005 = vst [vmem:[#allocation8 + $0x40] sm:$0xff] %v2989_v63 }
 0x38d   :  { %3006 = vst [vmem:[#allocation8 + $0x48] sm:$0xff] %v2990_v8  ;;  %3007 = vst [vmem:[#allocation8 + $0x50] sm:$0xff] %v2991_v55 }
 0x38e   :  { %3008 = vst [vmem:[#allocation8 + $0x58] sm:$0xff] %v2992_v24  ;;  %3009 = vst [vmem:[#allocation8 + $0x60] sm:$0xff] %v2993_v22 }
 0x38f   :  { %3010 = vst [vmem:[#allocation8 + $0x68] sm:$0xff] %v2994_v30  ;;  %3011 = vst [vmem:[#allocation8 + $0x70] sm:$0xff] %v2995_v28 }
 0x390   :  { %4113 = shalt.err (!%p4110_p0)
}
 0x391   :  { %s4114_s24 = scalar_lea.hbm %s5395_s7, 2048 }
 0x392   :  { %p4115_p1 = scmp.ne.s32.totalorder %s5395_s7, %s4114_s24  ;;  %p4118_p2 = scmp.lt.u32.totalorder %s4114_s24, %s5395_s7 }
 0x394   :  { %p4120_p3 = pnand %p4118_p2, %p4115_p1 }
 0x396   :  { %4123 = shalt.err (!%p4120_p3)
}
 0x397   :  { %3024 = dma.vmem_to_hbm [thread:$0]  %s3019_s6, 2048, %s5395_s7, [#allocation4], %s4134_s1, %s4134_s1, %s4135_s25  }
 0x398   :  { %4128 = dma.done.wait [#allocation4], 2048  }
 0x399   :  { %4129 = vsyncadd [#allocation4], 4294965248 }
 0x39a   :  { %3028 = vsyncpa [#allocation3], 1 }
 0x39b   :  { %3029 = vsyncpa [#allocation6], 1 }
 0x39c   :  { %3030 = vsyncpa [#allocation4], 1 }

</bundles_post_ra>
